<compile_context>
chip_gen: v5e
topology: v5e:2x2
jax: 0.10.0
libtpu: 0.0.40
codegen_flags: <defaults>
</compile_context>

<pallas_src>
import jax
import jax.numpy as jnp
from jax.experimental import pallas as pl
from jax.experimental.pallas import tpu as pltpu


# ------------------------------ fused kernel --------------------------------
def _fused_fcdisc_kernel(x_ref, *refs):
    n_layers = (len(refs) - 1) // 3
    t_refs = refs[:n_layers]                      # (W*Cin, 4*Wo*Cout) per layer
    g_refs = refs[n_layers:2 * n_layers]          # (4, TB*Ho, TB*H)   per layer
    b_refs = refs[2 * n_layers:3 * n_layers]      # (1, Wo*Cout)       per layer
    o_ref = refs[3 * n_layers]

    # Unpadded, batch-stacked, W*C-flattened activation: (TB*H, W*Cin).
    a = x_ref[0]
    for li in range(n_layers):
        wocout = t_refs[li].shape[1] // 4
        # Horizontal taps + weights (padding already folded in): (TB*H, 4*Wo*Cout).
        b_all = jnp.dot(a, t_refs[li][...], preferred_element_type=jnp.float32)
        # Vertical stride-2 tap selection: 4 accumulating 0/1 matmuls over
        # 128-aligned lane slices of b_all (no sublane concat).
        y = jnp.dot(g_refs[li][0], b_all[:, :wocout],
                    preferred_element_type=jnp.float32)
        for dy in range(1, 4):
            y = y + jnp.dot(g_refs[li][dy],
                            b_all[:, dy * wocout:(dy + 1) * wocout],
                            preferred_element_type=jnp.float32)
        y = y + b_refs[li][...]
        if li < n_layers - 1:
            a = jnp.maximum(y, 0.2 * y)           # LeakyReLU(0.2)
        else:
            # Classifier (Cout=1): y is (TB*Ho5, Wo5).
            o_ref[0] = y.astype(o_ref.dtype)


# --------------------- one-time structured-weight prep -----------------------
def _build_layer_mats(w_oihw, bias, h_in, w_in, tb):
    """Structured matrices for one Conv2d(k=4, s=2, p=1) on UNPADDED activations.

    Returns:
      tcat: (w_in*cin, 4*(w_in//2)*cout) -- horizontal taps x weights per dy,
            concatenated over dy along columns; taps landing on the p=1 padding
            are simply dropped.
      gblk: (4, tb*(h_in//2), tb*h_in)   -- per-dy 0/1 vertical (stride-2) tap
            selectors, block-diagonal over the tb batch samples; taps landing
            on padded rows are dropped.
      brow: (1, (w_in//2)*cout)          -- bias tiled over output columns.
    """
    cout, cin, kh, kw = w_oihw.shape
    assert (kh, kw) == (4, 4)
    ho, wo = h_in // 2, w_in // 2

    # wk[dy, dx, cin, cout]
    wk = jnp.transpose(w_oihw, (2, 3, 1, 0)).astype(jnp.float32)

    # Horizontal: output col wo reads unpadded input cols w = 2*wo + dx - 1.
    w_idx = jnp.arange(w_in)[:, None]            # unpadded input column w
    wo_idx = jnp.arange(wo)[None, :]             # output column wo
    dx = w_idx - 2 * wo_idx + 1                  # (w_in, wo)
    valid = ((dx >= 0) & (dx < 4)).astype(jnp.float32)
    dx_c = jnp.clip(dx, 0, 3)
    # taps[dy, w, wo, ci, co] = wk[dy, w - 2*wo + 1, ci, co] if valid else 0
    taps = wk[:, dx_c, :, :] * valid[None, :, :, None, None]
    t_per_dy = jnp.transpose(taps, (0, 1, 3, 2, 4)).reshape(4, w_in * cin, wo * cout)
    tcat = jnp.concatenate([t_per_dy[d] for d in range(4)], axis=1)

    # Vertical: output row ho reads unpadded input row h = 2*ho + dy - 1.
    h_idx = jnp.arange(h_in)[None, None, :]
    ho_idx = jnp.arange(ho)[None, :, None]
    dy_idx = jnp.arange(4)[:, None, None]
    g = (h_idx == 2 * ho_idx + dy_idx - 1).astype(jnp.float32)       # (4, ho, h_in)
    # Block-diagonal over the tb samples stacked along sublanes.
    eye = jnp.eye(tb, dtype=jnp.float32)
    gblk = jnp.einsum("ab,dij->daibj", eye, g).reshape(4, tb * ho, tb * h_in)

    brow = jnp.tile(bias.reshape(1, 1, cout).astype(jnp.float32),
                    (1, wo, 1)).reshape(1, wo * cout)
    return tcat, gblk, brow


def precompute_fcdisc_mats(params, height, width, tb):
    """One-time layout plumbing, hoisted out of the forward path."""
    assert height % 32 == 0 and width % 32 == 0, "need 5 exact stride-2 halvings"
    tcats, gblks, brows = [], [], []
    h, w = height, width
    for wgt, bias in params:
        tcat, gblk, brow = _build_layer_mats(wgt, bias, h, w, tb)
        tcats.append(tcat)
        gblks.append(gblk)
        brows.append(brow)
        h, w = h // 2, w // 2
    return tcats, gblks, brows


# ------------------------------ forward pass ---------------------------------
def fc_discriminator_forward(x_nchw, mats, tb):
    tcats, gblks, brows = mats
    n, cin, height, width = x_nchw.shape
    assert n % tb == 0, "batch must be divisible by the batch tile TB"
    n_steps = n // tb
    ho5, wo5 = height // 32, width // 32

    # NCHW -> unpadded, W*C-flattened, batch-stacked blocks:
    #   xa[step, b*H + h, w*Cin + c] = x[step*TB + b, c, h, w]
    xa = jnp.transpose(x_nchw, (0, 2, 3, 1)).reshape(n, height, width * cin)
    xa = xa.reshape(n_steps, tb * height, width * cin).astype(jnp.float32)

    out = pl.pallas_call(
        _fused_fcdisc_kernel,
        out_shape=jax.ShapeDtypeStruct((n_steps, tb * ho5, wo5), jnp.float32),
        grid=(n_steps,),
        in_specs=(
            [pl.BlockSpec((1, tb * height, width * cin), lambda i: (i, 0, 0))]
            + [pl.BlockSpec(t.shape, lambda i: (0, 0)) for t in tcats]
            + [pl.BlockSpec(g.shape, lambda i: (0, 0, 0)) for g in gblks]
            + [pl.BlockSpec(b.shape, lambda i: (0, 0)) for b in brows]
        ),
        out_specs=pl.BlockSpec((1, tb * ho5, wo5), lambda i: (i, 0, 0)),
        compiler_params=pltpu.CompilerParams(
            dimension_semantics=("parallel",),
            vmem_limit_bytes=48 * 1024 * 1024,
        ),
    )(xa, *tcats, *gblks, *brows)
    # (n_steps, TB*Ho5, Wo5) -> NCHW (N, 1, Ho5, Wo5); the classifier has Cout=1.
    return out.reshape(n_steps, tb, ho5, wo5).reshape(n, 1, ho5, wo5)


# ------------------------------ params / test --------------------------------
def init_params(key, num_classes, ndf):
    """Deterministic synthetic init (shapes match the PyTorch module)."""
    chans = [
        (num_classes, ndf),
        (ndf, ndf * 2),
        (ndf * 2, ndf * 4),
        (ndf * 4, ndf * 8),
        (ndf * 8, 1),
    ]
    params = []
    for cin, cout in chans:
        key, kw, kb = jax.random.split(key, 3)
        fan_in = cin * 4 * 4
        w = jax.random.normal(kw, (cout, cin, 4, 4), jnp.float32) * (fan_in ** -0.5)
        b = jax.random.normal(kb, (cout,), jnp.float32) * 0.01
        params.append((w, b))
    return params


def _reference_forward(x_nchw, params):
    """Pure-XLA reference for correctness checking."""
    x = x_nchw
    n_layers = len(params)
    for li, (w, b) in enumerate(params):
        x = jax.lax.conv_general_dilated(
            x, w, window_strides=(2, 2), padding=[(1, 1), (1, 1)],
            dimension_numbers=("NCHW", "OIHW", "NCHW"),
            precision=jax.lax.Precision.HIGHEST,
        ) + b.reshape(1, -1, 1, 1)
        if li < n_layers - 1:
            x = jnp.where(x >= 0.0, x, 0.2 * x)
    return x


if __name__ == "__main__":
    num_classes, ndf = 4, 8
    batch, spatial = 4, 32      # 5 stride-2 convs: 32 -> 16 -> 8 -> 4 -> 2 -> 1
    tb = 2                      # batch tile per grid step; grid=(2,) keeps both
                                # v7x TensorCores busy while fattening matmul M

    key = jax.random.PRNGKey(0)
    key, kx = jax.random.split(key)
    x = jax.random.normal(kx, (batch, num_classes, spatial, spatial), jnp.float32)
    params = init_params(key, num_classes, ndf)

    # Hoisted, one-time weight layout plumbing (outside the hot forward path).
    mats = precompute_fcdisc_mats(params, spatial, spatial, tb)

    fwd = jax.jit(fc_discriminator_forward, static_argnums=(2,))
    out = jax.block_until_ready(fwd(x, mats, tb))
    ref = jax.block_until_ready(_reference_forward(x, params))

    assert out.shape == (batch, 1, 1, 1), out.shape
    max_err = float(jnp.max(jnp.abs(out - ref)))
    assert jnp.allclose(out, ref, atol=1e-3, rtol=1e-3), max_err
    print("KERNEL_OK")
</pallas_src>

<mosaic_0001>
module attributes {stable_mosaic.version = 11 : i64} {
  func.func @_fused_fcdisc_kernel(%arg0: i32, %arg1: memref<1x64x128xf32, #tpu.memory_space<vmem>>, %arg2: memref<128x512xf32, #tpu.memory_space<vmem>>, %arg3: memref<128x512xf32, #tpu.memory_space<vmem>>, %arg4: memref<128x512xf32, #tpu.memory_space<vmem>>, %arg5: memref<128x512xf32, #tpu.memory_space<vmem>>, %arg6: memref<128x4xf32, #tpu.memory_space<vmem>>, %arg7: memref<4x32x64xf32, #tpu.memory_space<vmem>>, %arg8: memref<4x16x32xf32, #tpu.memory_space<vmem>>, %arg9: memref<4x8x16xf32, #tpu.memory_space<vmem>>, %arg10: memref<4x4x8xf32, #tpu.memory_space<vmem>>, %arg11: memref<4x2x4xf32, #tpu.memory_space<vmem>>, %arg12: memref<1x128xf32, #tpu.memory_space<vmem>>, %arg13: memref<1x128xf32, #tpu.memory_space<vmem>>, %arg14: memref<1x128xf32, #tpu.memory_space<vmem>>, %arg15: memref<1x128xf32, #tpu.memory_space<vmem>>, %arg16: memref<1x1xf32, #tpu.memory_space<vmem>>, %arg17: memref<1x2x1xf32, #tpu.memory_space<vmem>>) attributes {dimension_semantics = [#tpu.dimension_semantics<parallel>], iteration_bounds = array<i64: 2>, scalar_prefetch = 0 : i64, scratch_operands = 0 : i64, tpu.core_type = #tpu.core_type<tc>, window_params = [{transform_indices = @transform_0, window_bounds = array<i64: 1, 64, 128>}, {pipeline_mode = #tpu.pipeline_mode<synchronous>, transform_indices = @transform_1, window_bounds = array<i64: 128, 512>}, {pipeline_mode = #tpu.pipeline_mode<synchronous>, transform_indices = @transform_2, window_bounds = array<i64: 128, 512>}, {pipeline_mode = #tpu.pipeline_mode<synchronous>, transform_indices = @transform_3, window_bounds = array<i64: 128, 512>}, {pipeline_mode = #tpu.pipeline_mode<synchronous>, transform_indices = @transform_4, window_bounds = array<i64: 128, 512>}, {pipeline_mode = #tpu.pipeline_mode<synchronous>, transform_indices = @transform_5, window_bounds = array<i64: 128, 4>}, {pipeline_mode = #tpu.pipeline_mode<synchronous>, transform_indices = @transform_6, window_bounds = array<i64: 4, 32, 64>}, {pipeline_mode = #tpu.pipeline_mode<synchronous>, transform_indices = @transform_7, window_bounds = array<i64: 4, 16, 32>}, {pipeline_mode = #tpu.pipeline_mode<synchronous>, transform_indices = @transform_8, window_bounds = array<i64: 4, 8, 16>}, {pipeline_mode = #tpu.pipeline_mode<synchronous>, transform_indices = @transform_9, window_bounds = array<i64: 4, 4, 8>}, {pipeline_mode = #tpu.pipeline_mode<synchronous>, transform_indices = @transform_10, window_bounds = array<i64: 4, 2, 4>}, {pipeline_mode = #tpu.pipeline_mode<synchronous>, transform_indices = @transform_11, window_bounds = array<i64: 1, 128>}, {pipeline_mode = #tpu.pipeline_mode<synchronous>, transform_indices = @transform_12, window_bounds = array<i64: 1, 128>}, {pipeline_mode = #tpu.pipeline_mode<synchronous>, transform_indices = @transform_13, window_bounds = array<i64: 1, 128>}, {pipeline_mode = #tpu.pipeline_mode<synchronous>, transform_indices = @transform_14, window_bounds = array<i64: 1, 128>}, {pipeline_mode = #tpu.pipeline_mode<synchronous>, transform_indices = @transform_15, window_bounds = array<i64: 1, 1>}, {transform_indices = @transform_16, window_bounds = array<i64: 1, 2, 1>}]} {
    %c0 = arith.constant 0 : index
    %c0_0 = arith.constant 0 : index
    %c0_1 = arith.constant 0 : index
    %0 = vector.load %arg1[%c0, %c0_0, %c0_1] : memref<1x64x128xf32, #tpu.memory_space<vmem>>, vector<1x64x128xf32>
    %1 = vector.shape_cast %0 : vector<1x64x128xf32> to vector<64x128xf32>
    %c0_2 = arith.constant 0 : index
    %c0_3 = arith.constant 0 : index
    %2 = vector.load %arg2[%c0_2, %c0_3] : memref<128x512xf32, #tpu.memory_space<vmem>>, vector<128x512xf32>
    %cst = arith.constant dense<0.000000e+00> : vector<64x512xf32>
    %3 = tpu.matmul %1, %2, %cst {dimension_numbers = #tpu.dot_dimension_numbers<[1], [0], [0], [1], [0, 0, 1, 1], [], []>} : vector<64x128xf32>, vector<128x512xf32>, vector<64x512xf32> -> vector<64x512xf32>
    %c0_4 = arith.constant 0 : index
    %c0_5 = arith.constant 0 : index
    %c0_6 = arith.constant 0 : index
    %4 = vector.load %arg7[%c0_4, %c0_5, %c0_6] : memref<4x32x64xf32, #tpu.memory_space<vmem>>, vector<1x32x64xf32>
    %5 = vector.shape_cast %4 : vector<1x32x64xf32> to vector<32x64xf32>
    %6 = vector.extract_strided_slice %3 {offsets = [0, 0], sizes = [64, 128], strides = [1, 1]} : vector<64x512xf32> to vector<64x128xf32>
    %cst_7 = arith.constant dense<0.000000e+00> : vector<32x128xf32>
    %7 = tpu.matmul %5, %6, %cst_7 {dimension_numbers = #tpu.dot_dimension_numbers<[1], [0], [0], [1], [0, 0, 1, 1], [], []>} : vector<32x64xf32>, vector<64x128xf32>, vector<32x128xf32> -> vector<32x128xf32>
    %c1 = arith.constant 1 : index
    %c0_8 = arith.constant 0 : index
    %c0_9 = arith.constant 0 : index
    %8 = vector.load %arg7[%c1, %c0_8, %c0_9] : memref<4x32x64xf32, #tpu.memory_space<vmem>>, vector<1x32x64xf32>
    %9 = vector.shape_cast %8 : vector<1x32x64xf32> to vector<32x64xf32>
    %10 = vector.extract_strided_slice %3 {offsets = [0, 128], sizes = [64, 128], strides = [1, 1]} : vector<64x512xf32> to vector<64x128xf32>
    %cst_10 = arith.constant dense<0.000000e+00> : vector<32x128xf32>
    %11 = tpu.matmul %9, %10, %cst_10 {dimension_numbers = #tpu.dot_dimension_numbers<[1], [0], [0], [1], [0, 0, 1, 1], [], []>} : vector<32x64xf32>, vector<64x128xf32>, vector<32x128xf32> -> vector<32x128xf32>
    %12 = arith.addf %7, %11 : vector<32x128xf32>
    %c2 = arith.constant 2 : index
    %c0_11 = arith.constant 0 : index
    %c0_12 = arith.constant 0 : index
    %13 = vector.load %arg7[%c2, %c0_11, %c0_12] : memref<4x32x64xf32, #tpu.memory_space<vmem>>, vector<1x32x64xf32>
    %14 = vector.shape_cast %13 : vector<1x32x64xf32> to vector<32x64xf32>
    %15 = vector.extract_strided_slice %3 {offsets = [0, 256], sizes = [64, 128], strides = [1, 1]} : vector<64x512xf32> to vector<64x128xf32>
    %cst_13 = arith.constant dense<0.000000e+00> : vector<32x128xf32>
    %16 = tpu.matmul %14, %15, %cst_13 {dimension_numbers = #tpu.dot_dimension_numbers<[1], [0], [0], [1], [0, 0, 1, 1], [], []>} : vector<32x64xf32>, vector<64x128xf32>, vector<32x128xf32> -> vector<32x128xf32>
    %17 = arith.addf %12, %16 : vector<32x128xf32>
    %c3 = arith.constant 3 : index
    %c0_14 = arith.constant 0 : index
    %c0_15 = arith.constant 0 : index
    %18 = vector.load %arg7[%c3, %c0_14, %c0_15] : memref<4x32x64xf32, #tpu.memory_space<vmem>>, vector<1x32x64xf32>
    %19 = vector.shape_cast %18 : vector<1x32x64xf32> to vector<32x64xf32>
    %20 = vector.extract_strided_slice %3 {offsets = [0, 384], sizes = [64, 128], strides = [1, 1]} : vector<64x512xf32> to vector<64x128xf32>
    %cst_16 = arith.constant dense<0.000000e+00> : vector<32x128xf32>
    %21 = tpu.matmul %19, %20, %cst_16 {dimension_numbers = #tpu.dot_dimension_numbers<[1], [0], [0], [1], [0, 0, 1, 1], [], []>} : vector<32x64xf32>, vector<64x128xf32>, vector<32x128xf32> -> vector<32x128xf32>
    %22 = arith.addf %17, %21 : vector<32x128xf32>
    %c0_17 = arith.constant 0 : index
    %c0_18 = arith.constant 0 : index
    %23 = vector.load %arg12[%c0_17, %c0_18] : memref<1x128xf32, #tpu.memory_space<vmem>>, vector<1x128xf32>
    %24 = vector.broadcast %23 : vector<1x128xf32> to vector<32x128xf32>
    %25 = arith.addf %22, %24 : vector<32x128xf32>
    %cst_19 = arith.constant 2.000000e-01 : f32
    %26 = vector.broadcast %cst_19 : f32 to vector<32x128xf32>
    %27 = arith.mulf %26, %25 : vector<32x128xf32>
    %28 = arith.maximumf %25, %27 : vector<32x128xf32>
    %c0_20 = arith.constant 0 : index
    %c0_21 = arith.constant 0 : index
    %29 = vector.load %arg3[%c0_20, %c0_21] : memref<128x512xf32, #tpu.memory_space<vmem>>, vector<128x512xf32>
    %cst_22 = arith.constant dense<0.000000e+00> : vector<32x512xf32>
    %30 = tpu.matmul %28, %29, %cst_22 {dimension_numbers = #tpu.dot_dimension_numbers<[1], [0], [0], [1], [0, 0, 1, 1], [], []>} : vector<32x128xf32>, vector<128x512xf32>, vector<32x512xf32> -> vector<32x512xf32>
    %c0_23 = arith.constant 0 : index
    %c0_24 = arith.constant 0 : index
    %c0_25 = arith.constant 0 : index
    %31 = vector.load %arg8[%c0_23, %c0_24, %c0_25] : memref<4x16x32xf32, #tpu.memory_space<vmem>>, vector<1x16x32xf32>
    %32 = vector.shape_cast %31 : vector<1x16x32xf32> to vector<16x32xf32>
    %33 = vector.extract_strided_slice %30 {offsets = [0, 0], sizes = [32, 128], strides = [1, 1]} : vector<32x512xf32> to vector<32x128xf32>
    %cst_26 = arith.constant dense<0.000000e+00> : vector<16x128xf32>
    %34 = tpu.matmul %32, %33, %cst_26 {dimension_numbers = #tpu.dot_dimension_numbers<[1], [0], [0], [1], [0, 0, 1, 1], [], []>} : vector<16x32xf32>, vector<32x128xf32>, vector<16x128xf32> -> vector<16x128xf32>
    %c1_27 = arith.constant 1 : index
    %c0_28 = arith.constant 0 : index
    %c0_29 = arith.constant 0 : index
    %35 = vector.load %arg8[%c1_27, %c0_28, %c0_29] : memref<4x16x32xf32, #tpu.memory_space<vmem>>, vector<1x16x32xf32>
    %36 = vector.shape_cast %35 : vector<1x16x32xf32> to vector<16x32xf32>
    %37 = vector.extract_strided_slice %30 {offsets = [0, 128], sizes = [32, 128], strides = [1, 1]} : vector<32x512xf32> to vector<32x128xf32>
    %cst_30 = arith.constant dense<0.000000e+00> : vector<16x128xf32>
    %38 = tpu.matmul %36, %37, %cst_30 {dimension_numbers = #tpu.dot_dimension_numbers<[1], [0], [0], [1], [0, 0, 1, 1], [], []>} : vector<16x32xf32>, vector<32x128xf32>, vector<16x128xf32> -> vector<16x128xf32>
    %39 = arith.addf %34, %38 : vector<16x128xf32>
    %c2_31 = arith.constant 2 : index
    %c0_32 = arith.constant 0 : index
    %c0_33 = arith.constant 0 : index
    %40 = vector.load %arg8[%c2_31, %c0_32, %c0_33] : memref<4x16x32xf32, #tpu.memory_space<vmem>>, vector<1x16x32xf32>
    %41 = vector.shape_cast %40 : vector<1x16x32xf32> to vector<16x32xf32>
    %42 = vector.extract_strided_slice %30 {offsets = [0, 256], sizes = [32, 128], strides = [1, 1]} : vector<32x512xf32> to vector<32x128xf32>
    %cst_34 = arith.constant dense<0.000000e+00> : vector<16x128xf32>
    %43 = tpu.matmul %41, %42, %cst_34 {dimension_numbers = #tpu.dot_dimension_numbers<[1], [0], [0], [1], [0, 0, 1, 1], [], []>} : vector<16x32xf32>, vector<32x128xf32>, vector<16x128xf32> -> vector<16x128xf32>
    %44 = arith.addf %39, %43 : vector<16x128xf32>
    %c3_35 = arith.constant 3 : index
    %c0_36 = arith.constant 0 : index
    %c0_37 = arith.constant 0 : index
    %45 = vector.load %arg8[%c3_35, %c0_36, %c0_37] : memref<4x16x32xf32, #tpu.memory_space<vmem>>, vector<1x16x32xf32>
    %46 = vector.shape_cast %45 : vector<1x16x32xf32> to vector<16x32xf32>
    %47 = vector.extract_strided_slice %30 {offsets = [0, 384], sizes = [32, 128], strides = [1, 1]} : vector<32x512xf32> to vector<32x128xf32>
    %cst_38 = arith.constant dense<0.000000e+00> : vector<16x128xf32>
    %48 = tpu.matmul %46, %47, %cst_38 {dimension_numbers = #tpu.dot_dimension_numbers<[1], [0], [0], [1], [0, 0, 1, 1], [], []>} : vector<16x32xf32>, vector<32x128xf32>, vector<16x128xf32> -> vector<16x128xf32>
    %49 = arith.addf %44, %48 : vector<16x128xf32>
    %c0_39 = arith.constant 0 : index
    %c0_40 = arith.constant 0 : index
    %50 = vector.load %arg13[%c0_39, %c0_40] : memref<1x128xf32, #tpu.memory_space<vmem>>, vector<1x128xf32>
    %51 = vector.broadcast %50 : vector<1x128xf32> to vector<16x128xf32>
    %52 = arith.addf %49, %51 : vector<16x128xf32>
    %cst_41 = arith.constant 2.000000e-01 : f32
    %53 = vector.broadcast %cst_41 : f32 to vector<16x128xf32>
    %54 = arith.mulf %53, %52 : vector<16x128xf32>
    %55 = arith.maximumf %52, %54 : vector<16x128xf32>
    %c0_42 = arith.constant 0 : index
    %c0_43 = arith.constant 0 : index
    %56 = vector.load %arg4[%c0_42, %c0_43] : memref<128x512xf32, #tpu.memory_space<vmem>>, vector<128x512xf32>
    %cst_44 = arith.constant dense<0.000000e+00> : vector<16x512xf32>
    %57 = tpu.matmul %55, %56, %cst_44 {dimension_numbers = #tpu.dot_dimension_numbers<[1], [0], [0], [1], [0, 0, 1, 1], [], []>} : vector<16x128xf32>, vector<128x512xf32>, vector<16x512xf32> -> vector<16x512xf32>
    %c0_45 = arith.constant 0 : index
    %c0_46 = arith.constant 0 : index
    %c0_47 = arith.constant 0 : index
    %58 = vector.load %arg9[%c0_45, %c0_46, %c0_47] : memref<4x8x16xf32, #tpu.memory_space<vmem>>, vector<1x8x16xf32>
    %59 = vector.shape_cast %58 : vector<1x8x16xf32> to vector<8x16xf32>
    %60 = vector.extract_strided_slice %57 {offsets = [0, 0], sizes = [16, 128], strides = [1, 1]} : vector<16x512xf32> to vector<16x128xf32>
    %cst_48 = arith.constant dense<0.000000e+00> : vector<8x128xf32>
    %61 = tpu.matmul %59, %60, %cst_48 {dimension_numbers = #tpu.dot_dimension_numbers<[1], [0], [0], [1], [0, 0, 1, 1], [], []>} : vector<8x16xf32>, vector<16x128xf32>, vector<8x128xf32> -> vector<8x128xf32>
    %c1_49 = arith.constant 1 : index
    %c0_50 = arith.constant 0 : index
    %c0_51 = arith.constant 0 : index
    %62 = vector.load %arg9[%c1_49, %c0_50, %c0_51] : memref<4x8x16xf32, #tpu.memory_space<vmem>>, vector<1x8x16xf32>
    %63 = vector.shape_cast %62 : vector<1x8x16xf32> to vector<8x16xf32>
    %64 = vector.extract_strided_slice %57 {offsets = [0, 128], sizes = [16, 128], strides = [1, 1]} : vector<16x512xf32> to vector<16x128xf32>
    %cst_52 = arith.constant dense<0.000000e+00> : vector<8x128xf32>
    %65 = tpu.matmul %63, %64, %cst_52 {dimension_numbers = #tpu.dot_dimension_numbers<[1], [0], [0], [1], [0, 0, 1, 1], [], []>} : vector<8x16xf32>, vector<16x128xf32>, vector<8x128xf32> -> vector<8x128xf32>
    %66 = arith.addf %61, %65 : vector<8x128xf32>
    %c2_53 = arith.constant 2 : index
    %c0_54 = arith.constant 0 : index
    %c0_55 = arith.constant 0 : index
    %67 = vector.load %arg9[%c2_53, %c0_54, %c0_55] : memref<4x8x16xf32, #tpu.memory_space<vmem>>, vector<1x8x16xf32>
    %68 = vector.shape_cast %67 : vector<1x8x16xf32> to vector<8x16xf32>
    %69 = vector.extract_strided_slice %57 {offsets = [0, 256], sizes = [16, 128], strides = [1, 1]} : vector<16x512xf32> to vector<16x128xf32>
    %cst_56 = arith.constant dense<0.000000e+00> : vector<8x128xf32>
    %70 = tpu.matmul %68, %69, %cst_56 {dimension_numbers = #tpu.dot_dimension_numbers<[1], [0], [0], [1], [0, 0, 1, 1], [], []>} : vector<8x16xf32>, vector<16x128xf32>, vector<8x128xf32> -> vector<8x128xf32>
    %71 = arith.addf %66, %70 : vector<8x128xf32>
    %c3_57 = arith.constant 3 : index
    %c0_58 = arith.constant 0 : index
    %c0_59 = arith.constant 0 : index
    %72 = vector.load %arg9[%c3_57, %c0_58, %c0_59] : memref<4x8x16xf32, #tpu.memory_space<vmem>>, vector<1x8x16xf32>
    %73 = vector.shape_cast %72 : vector<1x8x16xf32> to vector<8x16xf32>
    %74 = vector.extract_strided_slice %57 {offsets = [0, 384], sizes = [16, 128], strides = [1, 1]} : vector<16x512xf32> to vector<16x128xf32>
    %cst_60 = arith.constant dense<0.000000e+00> : vector<8x128xf32>
    %75 = tpu.matmul %73, %74, %cst_60 {dimension_numbers = #tpu.dot_dimension_numbers<[1], [0], [0], [1], [0, 0, 1, 1], [], []>} : vector<8x16xf32>, vector<16x128xf32>, vector<8x128xf32> -> vector<8x128xf32>
    %76 = arith.addf %71, %75 : vector<8x128xf32>
    %c0_61 = arith.constant 0 : index
    %c0_62 = arith.constant 0 : index
    %77 = vector.load %arg14[%c0_61, %c0_62] : memref<1x128xf32, #tpu.memory_space<vmem>>, vector<1x128xf32>
    %78 = vector.broadcast %77 : vector<1x128xf32> to vector<8x128xf32>
    %79 = arith.addf %76, %78 : vector<8x128xf32>
    %cst_63 = arith.constant 2.000000e-01 : f32
    %80 = vector.broadcast %cst_63 : f32 to vector<8x128xf32>
    %81 = arith.mulf %80, %79 : vector<8x128xf32>
    %82 = arith.maximumf %79, %81 : vector<8x128xf32>
    %c0_64 = arith.constant 0 : index
    %c0_65 = arith.constant 0 : index
    %83 = vector.load %arg5[%c0_64, %c0_65] : memref<128x512xf32, #tpu.memory_space<vmem>>, vector<128x512xf32>
    %cst_66 = arith.constant dense<0.000000e+00> : vector<8x512xf32>
    %84 = tpu.matmul %82, %83, %cst_66 {dimension_numbers = #tpu.dot_dimension_numbers<[1], [0], [0], [1], [0, 0, 1, 1], [], []>} : vector<8x128xf32>, vector<128x512xf32>, vector<8x512xf32> -> vector<8x512xf32>
    %c0_67 = arith.constant 0 : index
    %c0_68 = arith.constant 0 : index
    %c0_69 = arith.constant 0 : index
    %85 = vector.load %arg10[%c0_67, %c0_68, %c0_69] : memref<4x4x8xf32, #tpu.memory_space<vmem>>, vector<1x4x8xf32>
    %86 = vector.shape_cast %85 : vector<1x4x8xf32> to vector<4x8xf32>
    %87 = vector.extract_strided_slice %84 {offsets = [0, 0], sizes = [8, 128], strides = [1, 1]} : vector<8x512xf32> to vector<8x128xf32>
    %cst_70 = arith.constant dense<0.000000e+00> : vector<4x128xf32>
    %88 = tpu.matmul %86, %87, %cst_70 {dimension_numbers = #tpu.dot_dimension_numbers<[1], [0], [0], [1], [0, 0, 1, 1], [], []>} : vector<4x8xf32>, vector<8x128xf32>, vector<4x128xf32> -> vector<4x128xf32>
    %c1_71 = arith.constant 1 : index
    %c0_72 = arith.constant 0 : index
    %c0_73 = arith.constant 0 : index
    %89 = vector.load %arg10[%c1_71, %c0_72, %c0_73] : memref<4x4x8xf32, #tpu.memory_space<vmem>>, vector<1x4x8xf32>
    %90 = vector.shape_cast %89 : vector<1x4x8xf32> to vector<4x8xf32>
    %91 = vector.extract_strided_slice %84 {offsets = [0, 128], sizes = [8, 128], strides = [1, 1]} : vector<8x512xf32> to vector<8x128xf32>
    %cst_74 = arith.constant dense<0.000000e+00> : vector<4x128xf32>
    %92 = tpu.matmul %90, %91, %cst_74 {dimension_numbers = #tpu.dot_dimension_numbers<[1], [0], [0], [1], [0, 0, 1, 1], [], []>} : vector<4x8xf32>, vector<8x128xf32>, vector<4x128xf32> -> vector<4x128xf32>
    %93 = arith.addf %88, %92 : vector<4x128xf32>
    %c2_75 = arith.constant 2 : index
    %c0_76 = arith.constant 0 : index
    %c0_77 = arith.constant 0 : index
    %94 = vector.load %arg10[%c2_75, %c0_76, %c0_77] : memref<4x4x8xf32, #tpu.memory_space<vmem>>, vector<1x4x8xf32>
    %95 = vector.shape_cast %94 : vector<1x4x8xf32> to vector<4x8xf32>
    %96 = vector.extract_strided_slice %84 {offsets = [0, 256], sizes = [8, 128], strides = [1, 1]} : vector<8x512xf32> to vector<8x128xf32>
    %cst_78 = arith.constant dense<0.000000e+00> : vector<4x128xf32>
    %97 = tpu.matmul %95, %96, %cst_78 {dimension_numbers = #tpu.dot_dimension_numbers<[1], [0], [0], [1], [0, 0, 1, 1], [], []>} : vector<4x8xf32>, vector<8x128xf32>, vector<4x128xf32> -> vector<4x128xf32>
    %98 = arith.addf %93, %97 : vector<4x128xf32>
    %c3_79 = arith.constant 3 : index
    %c0_80 = arith.constant 0 : index
    %c0_81 = arith.constant 0 : index
    %99 = vector.load %arg10[%c3_79, %c0_80, %c0_81] : memref<4x4x8xf32, #tpu.memory_space<vmem>>, vector<1x4x8xf32>
    %100 = vector.shape_cast %99 : vector<1x4x8xf32> to vector<4x8xf32>
    %101 = vector.extract_strided_slice %84 {offsets = [0, 384], sizes = [8, 128], strides = [1, 1]} : vector<8x512xf32> to vector<8x128xf32>
    %cst_82 = arith.constant dense<0.000000e+00> : vector<4x128xf32>
    %102 = tpu.matmul %100, %101, %cst_82 {dimension_numbers = #tpu.dot_dimension_numbers<[1], [0], [0], [1], [0, 0, 1, 1], [], []>} : vector<4x8xf32>, vector<8x128xf32>, vector<4x128xf32> -> vector<4x128xf32>
    %103 = arith.addf %98, %102 : vector<4x128xf32>
    %c0_83 = arith.constant 0 : index
    %c0_84 = arith.constant 0 : index
    %104 = vector.load %arg15[%c0_83, %c0_84] : memref<1x128xf32, #tpu.memory_space<vmem>>, vector<1x128xf32>
    %105 = vector.broadcast %104 : vector<1x128xf32> to vector<4x128xf32>
    %106 = arith.addf %103, %105 : vector<4x128xf32>
    %cst_85 = arith.constant 2.000000e-01 : f32
    %107 = vector.broadcast %cst_85 : f32 to vector<4x128xf32>
    %108 = arith.mulf %107, %106 : vector<4x128xf32>
    %109 = arith.maximumf %106, %108 : vector<4x128xf32>
    %c0_86 = arith.constant 0 : index
    %c0_87 = arith.constant 0 : index
    %110 = vector.load %arg6[%c0_86, %c0_87] : memref<128x4xf32, #tpu.memory_space<vmem>>, vector<128x4xf32>
    %cst_88 = arith.constant dense<0.000000e+00> : vector<4x4xf32>
    %111 = tpu.matmul %109, %110, %cst_88 {dimension_numbers = #tpu.dot_dimension_numbers<[1], [0], [0], [1], [0, 0, 1, 1], [], []>} : vector<4x128xf32>, vector<128x4xf32>, vector<4x4xf32> -> vector<4x4xf32>
    %c0_89 = arith.constant 0 : index
    %c0_90 = arith.constant 0 : index
    %c0_91 = arith.constant 0 : index
    %112 = vector.load %arg11[%c0_89, %c0_90, %c0_91] : memref<4x2x4xf32, #tpu.memory_space<vmem>>, vector<1x2x4xf32>
    %113 = vector.shape_cast %112 : vector<1x2x4xf32> to vector<2x4xf32>
    %114 = vector.extract_strided_slice %111 {offsets = [0, 0], sizes = [4, 1], strides = [1, 1]} : vector<4x4xf32> to vector<4x1xf32>
    %cst_92 = arith.constant dense<0.000000e+00> : vector<2x1xf32>
    %115 = tpu.matmul %113, %114, %cst_92 {dimension_numbers = #tpu.dot_dimension_numbers<[1], [0], [0], [1], [0, 0, 1, 1], [], []>} : vector<2x4xf32>, vector<4x1xf32>, vector<2x1xf32> -> vector<2x1xf32>
    %c1_93 = arith.constant 1 : index
    %c0_94 = arith.constant 0 : index
    %c0_95 = arith.constant 0 : index
    %116 = vector.load %arg11[%c1_93, %c0_94, %c0_95] : memref<4x2x4xf32, #tpu.memory_space<vmem>>, vector<1x2x4xf32>
    %117 = vector.shape_cast %116 : vector<1x2x4xf32> to vector<2x4xf32>
    %118 = vector.extract_strided_slice %111 {offsets = [0, 1], sizes = [4, 1], strides = [1, 1]} : vector<4x4xf32> to vector<4x1xf32>
    %cst_96 = arith.constant dense<0.000000e+00> : vector<2x1xf32>
    %119 = tpu.matmul %117, %118, %cst_96 {dimension_numbers = #tpu.dot_dimension_numbers<[1], [0], [0], [1], [0, 0, 1, 1], [], []>} : vector<2x4xf32>, vector<4x1xf32>, vector<2x1xf32> -> vector<2x1xf32>
    %120 = arith.addf %115, %119 : vector<2x1xf32>
    %c2_97 = arith.constant 2 : index
    %c0_98 = arith.constant 0 : index
    %c0_99 = arith.constant 0 : index
    %121 = vector.load %arg11[%c2_97, %c0_98, %c0_99] : memref<4x2x4xf32, #tpu.memory_space<vmem>>, vector<1x2x4xf32>
    %122 = vector.shape_cast %121 : vector<1x2x4xf32> to vector<2x4xf32>
    %123 = vector.extract_strided_slice %111 {offsets = [0, 2], sizes = [4, 1], strides = [1, 1]} : vector<4x4xf32> to vector<4x1xf32>
    %cst_100 = arith.constant dense<0.000000e+00> : vector<2x1xf32>
    %124 = tpu.matmul %122, %123, %cst_100 {dimension_numbers = #tpu.dot_dimension_numbers<[1], [0], [0], [1], [0, 0, 1, 1], [], []>} : vector<2x4xf32>, vector<4x1xf32>, vector<2x1xf32> -> vector<2x1xf32>
    %125 = arith.addf %120, %124 : vector<2x1xf32>
    %c3_101 = arith.constant 3 : index
    %c0_102 = arith.constant 0 : index
    %c0_103 = arith.constant 0 : index
    %126 = vector.load %arg11[%c3_101, %c0_102, %c0_103] : memref<4x2x4xf32, #tpu.memory_space<vmem>>, vector<1x2x4xf32>
    %127 = vector.shape_cast %126 : vector<1x2x4xf32> to vector<2x4xf32>
    %128 = vector.extract_strided_slice %111 {offsets = [0, 3], sizes = [4, 1], strides = [1, 1]} : vector<4x4xf32> to vector<4x1xf32>
    %cst_104 = arith.constant dense<0.000000e+00> : vector<2x1xf32>
    %129 = tpu.matmul %127, %128, %cst_104 {dimension_numbers = #tpu.dot_dimension_numbers<[1], [0], [0], [1], [0, 0, 1, 1], [], []>} : vector<2x4xf32>, vector<4x1xf32>, vector<2x1xf32> -> vector<2x1xf32>
    %130 = arith.addf %125, %129 : vector<2x1xf32>
    %c0_105 = arith.constant 0 : index
    %c0_106 = arith.constant 0 : index
    %131 = vector.load %arg16[%c0_105, %c0_106] : memref<1x1xf32, #tpu.memory_space<vmem>>, vector<1x1xf32>
    %132 = vector.broadcast %131 : vector<1x1xf32> to vector<2x1xf32>
    %133 = arith.addf %130, %132 : vector<2x1xf32>
    %c0_107 = arith.constant 0 : index
    %c0_108 = arith.constant 0 : index
    %c0_109 = arith.constant 0 : index
    %134 = vector.load %arg17[%c0_107, %c0_108, %c0_109] : memref<1x2x1xf32, #tpu.memory_space<vmem>>, vector<1x2x1xf32>
    %135 = vector.shape_cast %134 : vector<1x2x1xf32> to vector<2x1xf32>
    %136 = vector.shape_cast %133 : vector<2x1xf32> to vector<1x2x1xf32>
    tpu.vector_store %arg17[%c0_107, %c0_108, %c0_109], %136 {strides = array<i32>} : memref<1x2x1xf32, #tpu.memory_space<vmem>>, vector<1x2x1xf32>,
    return
  }
  func.func @transform_0(%arg0: i32) -> (i32, i32, i32) {
    %c0_i32 = arith.constant 0 : i32
    %c0_i32_0 = arith.constant 0 : i32
    %c0_i32_1 = arith.constant 0 : i32
    return %arg0, %c0_i32, %c0_i32_0 : i32, i32, i32
  }
  func.func @transform_1(%arg0: i32) -> (i32, i32) {
    %c0_i32 = arith.constant 0 : i32
    %c0_i32_0 = arith.constant 0 : i32
    %c0_i32_1 = arith.constant 0 : i32
    return %c0_i32, %c0_i32_0 : i32, i32
  }
  func.func @transform_2(%arg0: i32) -> (i32, i32) {
    %c0_i32 = arith.constant 0 : i32
    %c0_i32_0 = arith.constant 0 : i32
    %c0_i32_1 = arith.constant 0 : i32
    return %c0_i32, %c0_i32_0 : i32, i32
  }
  func.func @transform_3(%arg0: i32) -> (i32, i32) {
    %c0_i32 = arith.constant 0 : i32
    %c0_i32_0 = arith.constant 0 : i32
    %c0_i32_1 = arith.constant 0 : i32
    return %c0_i32, %c0_i32_0 : i32, i32
  }
  func.func @transform_4(%arg0: i32) -> (i32, i32) {
    %c0_i32 = arith.constant 0 : i32
    %c0_i32_0 = arith.constant 0 : i32
    %c0_i32_1 = arith.constant 0 : i32
    return %c0_i32, %c0_i32_0 : i32, i32
  }
  func.func @transform_5(%arg0: i32) -> (i32, i32) {
    %c0_i32 = arith.constant 0 : i32
    %c0_i32_0 = arith.constant 0 : i32
    %c0_i32_1 = arith.constant 0 : i32
    return %c0_i32, %c0_i32_0 : i32, i32
  }
  func.func @transform_6(%arg0: i32) -> (i32, i32, i32) {
    %c0_i32 = arith.constant 0 : i32
    %c0_i32_0 = arith.constant 0 : i32
    %c0_i32_1 = arith.constant 0 : i32
    %c0_i32_2 = arith.constant 0 : i32
    return %c0_i32, %c0_i32_0, %c0_i32_1 : i32, i32, i32
  }
  func.func @transform_7(%arg0: i32) -> (i32, i32, i32) {
    %c0_i32 = arith.constant 0 : i32
    %c0_i32_0 = arith.constant 0 : i32
    %c0_i32_1 = arith.constant 0 : i32
    %c0_i32_2 = arith.constant 0 : i32
    return %c0_i32, %c0_i32_0, %c0_i32_1 : i32, i32, i32
  }
  func.func @transform_8(%arg0: i32) -> (i32, i32, i32) {
    %c0_i32 = arith.constant 0 : i32
    %c0_i32_0 = arith.constant 0 : i32
    %c0_i32_1 = arith.constant 0 : i32
    %c0_i32_2 = arith.constant 0 : i32
    return %c0_i32, %c0_i32_0, %c0_i32_1 : i32, i32, i32
  }
  func.func @transform_9(%arg0: i32) -> (i32, i32, i32) {
    %c0_i32 = arith.constant 0 : i32
    %c0_i32_0 = arith.constant 0 : i32
    %c0_i32_1 = arith.constant 0 : i32
    %c0_i32_2 = arith.constant 0 : i32
    return %c0_i32, %c0_i32_0, %c0_i32_1 : i32, i32, i32
  }
  func.func @transform_10(%arg0: i32) -> (i32, i32, i32) {
    %c0_i32 = arith.constant 0 : i32
    %c0_i32_0 = arith.constant 0 : i32
    %c0_i32_1 = arith.constant 0 : i32
    %c0_i32_2 = arith.constant 0 : i32
    return %c0_i32, %c0_i32_0, %c0_i32_1 : i32, i32, i32
  }
  func.func @transform_11(%arg0: i32) -> (i32, i32) {
    %c0_i32 = arith.constant 0 : i32
    %c0_i32_0 = arith.constant 0 : i32
    %c0_i32_1 = arith.constant 0 : i32
    return %c0_i32, %c0_i32_0 : i32, i32
  }
  func.func @transform_12(%arg0: i32) -> (i32, i32) {
    %c0_i32 = arith.constant 0 : i32
    %c0_i32_0 = arith.constant 0 : i32
    %c0_i32_1 = arith.constant 0 : i32
    return %c0_i32, %c0_i32_0 : i32, i32
  }
  func.func @transform_13(%arg0: i32) -> (i32, i32) {
    %c0_i32 = arith.constant 0 : i32
    %c0_i32_0 = arith.constant 0 : i32
    %c0_i32_1 = arith.constant 0 : i32
    return %c0_i32, %c0_i32_0 : i32, i32
  }
  func.func @transform_14(%arg0: i32) -> (i32, i32) {
    %c0_i32 = arith.constant 0 : i32
    %c0_i32_0 = arith.constant 0 : i32
    %c0_i32_1 = arith.constant 0 : i32
    return %c0_i32, %c0_i32_0 : i32, i32
  }
  func.func @transform_15(%arg0: i32) -> (i32, i32) {
    %c0_i32 = arith.constant 0 : i32
    %c0_i32_0 = arith.constant 0 : i32
    %c0_i32_1 = arith.constant 0 : i32
    return %c0_i32, %c0_i32_0 : i32, i32
  }
  func.func @transform_16(%arg0: i32) -> (i32, i32, i32) {
    %c0_i32 = arith.constant 0 : i32
    %c0_i32_0 = arith.constant 0 : i32
    %c0_i32_1 = arith.constant 0 : i32
    return %arg0, %c0_i32, %c0_i32_0 : i32, i32, i32
  }
}

</mosaic_0001>

<bundles_post_ra>
// kernel: fc_discriminator_forward.1
= control target key start
LH: loop header
LB: loop body
LE: loop exit
PB: predicated region body
PF: predicated region fallthrough
CT: control target
= control target key end

     0   :  { %s2213_s23 = smov 0   ;;  %s3238_s0 = inlined_call_operand.vmem [shape: f32[2,64,128], index: 0, kind: input, shape index: {}]   ;;  %s3239_s1 = inlined_call_operand.vmem [shape: f32[128,512], index: 1, kind: input, shape index: {}]   ;;  %s3240_s2 = inlined_call_operand.vmem [shape: f32[128,512], index: 2, kind: input, shape index: {}]   ;;  %s3241_s3 = inlined_call_operand.vmem [shape: f32[128,512], index: 3, kind: input, shape index: {}]   ;;  %s3242_s4 = inlined_call_operand.vmem [shape: f32[128,512], index: 4, kind: input, shape index: {}]   ;;  %s3243_s5 = inlined_call_operand.vmem [shape: f32[128,4], index: 5, kind: input, shape index: {}]   ;;  %s3244_s6 = inlined_call_operand.vmem [shape: f32[4,32,64], index: 6, kind: input, shape index: {}]   ;;  %s3245_s7 = inlined_call_operand.vmem [shape: f32[4,16,32], index: 7, kind: input, shape index: {}]   ;;  %s3246_s8 = inlined_call_operand.vmem [shape: f32[4,8,16], index: 8, kind: input, shape index: {}]   ;;  %s3247_s9 = inlined_call_operand.vmem [shape: f32[4,4,8], index: 9, kind: input, shape index: {}]   ;;  %s3248_s10 = inlined_call_operand.vmem [shape: f32[4,2,4], index: 10, kind: input, shape index: {}]   ;;  %s3249_s11 = inlined_call_operand.vmem [shape: f32[1,128], index: 11, kind: input, shape index: {}]   ;;  %s3250_s12 = inlined_call_operand.vmem [shape: f32[1,128], index: 12, kind: input, shape index: {}]   ;;  %s3251_s13 = inlined_call_operand.vmem [shape: f32[1,128], index: 13, kind: input, shape index: {}]   ;;  %s3252_s14 = inlined_call_operand.vmem [shape: f32[1,128], index: 14, kind: input, shape index: {}]   ;;  %s3253_s15 = inlined_call_operand.<no memory space> [shape: f32[1,1], index: 15, kind: input, shape index: {}]   ;;  %s3254_s16 = inlined_call_operand.vmem [shape: f32[2,2,1], index: 16, kind: output, shape index: {}]  }
   0x1   :  { %3255 = sst [smem:[#allocation3_spill]] %s3238_s0  ;;  %v21_v0 = vstv %s3253_s15 }
   0x2   :  { %22 = vst [vmem:[#allocation2] sm:$0x1] %v21_v0 }
   0x3 LB: > { %s2020_s24 = sadd.s32 4294967295, %s2120_s23   ;;  %p2024_p0 = scmp.ge.s32.totalorder %s2120_s23, 1  ;;  %s2120_s23 = sphi %s2213_s23, %s28_s23  }
   0x4   : > { %p464_p1 = scmp.lt.s32.totalorder %s2120_s23, 3 }
   0x6   : > { %p465_p2 = pnand %p2024_p0, %p464_p1 }
   0x7   : > { %p2337_p3 = scmp.lt.s32.totalorder (!%p465_p2), %s2020_s24, 1  ;;  %s3257_s25 = sld [smem:[#allocation3_spill]] (!%p465_p2) }
   0x8   : > { %468 = sbr.rel (%p465_p2) target bundleno = 1650 (0x672), region = 84  ;;  %s2123_s17 = smov (!%p465_p2), 125  }
   0x9   : > { %s2124_s18 = smov (!%p465_p2), 126  }
   0xd   : > { %v590_v1 = vld [vmem:[%s3239_s1 + $0x1e0] sm:$0xff]  ;;  %v591_v2 = vld [vmem:[%s3239_s1 + $0x1e8] sm:$0xff]  ;;  %v592_v3 = vld [vmem:[%s3239_s1 + $0x1f0] sm:$0xff]  ;;  %s3259_s24 = smov (!%p2337_p3, %s2020_s24), 1  ;;  %vm767_vm0 = vcmask 523264   ;;  %vm1151_vm1 = vcmask 261120  }
   0xe   : > { %594 = vmatpush.msra.mxu0 %v590_v1  ;;  %635 = vmatpush.msra.mxu1 %v591_v2  ;;  %v593_v4 = vld [vmem:[%s3239_s1 + $0x1f8] sm:$0xff]  ;;  %v586_v5 = vld [vmem:[%s3239_s1 + $0x1c0] sm:$0xff]  ;;  %v587_v6 = vld [vmem:[%s3239_s1 + $0x1c8] sm:$0xff]  ;;  %s2097_s21 = sshll.u32 %s3259_s24, 6  ;;  %vm1447_vm2 = vcmask 130048   ;;  %vm1700_vm3 = vcmask 64512  }
   0xf   : > { %676 = vmatpush.msra.mxu2 %v592_v3  ;;  %717 = vmatpush.msra.mxu3 %v593_v4  ;;  %v588_v7 = vld [vmem:[%s3239_s1 + $0x1d0] sm:$0xff]  ;;  %v589_v8 = vld [vmem:[%s3239_s1 + $0x1d8] sm:$0xff]  ;;  %v582_v9 = vld [vmem:[%s3239_s1 + $0x1a0] sm:$0xff]  ;;  %s2417_s26 = scalar_lea.vmem %s3257_s25, %s2097_s21  ;;  %vm1852_vm4 = vcmask 1043456   ;;  %s2122_s21 = smov 127   ;;  %vm1848_vm5 = vcmask 31744  }
  0x10   : > { %595 = vmatpush.msra.mxu0 %v586_v5  ;;  %636 = vmatpush.msra.mxu1 %v587_v6  ;;  %v583_v10 = vld [vmem:[%s3239_s1 + $0x1a8] sm:$0xff]  ;;  %v584_v11 = vld [vmem:[%s3239_s1 + $0x1b0] sm:$0xff]  ;;  %v585_v12 = vld [vmem:[%s3239_s1 + $0x1b8] sm:$0xff]  ;;  %s2027_s28 = sshll.u32 %s3259_s24, 1  ;;  %vm1965_vm6 = vcmask 1024  }
  0x11   : > { %677 = vmatpush.msra.mxu2 %v588_v7  ;;  %718 = vmatpush.msra.mxu3 %v589_v8  ;;  %v578_v13 = vld [vmem:[%s3239_s1 + $0x180] sm:$0xff]  ;;  %v579_v14 = vld [vmem:[%s3239_s1 + $0x188] sm:$0xff]  ;;  %v580_v15 = vld [vmem:[%s3239_s1 + $0x190] sm:$0xff] }
  0x12   : > { %596 = vmatpush.msra.mxu0 %v582_v9  ;;  %637 = vmatpush.msra.mxu1 %v583_v10  ;;  %v581_v16 = vld [vmem:[%s3239_s1 + $0x198] sm:$0xff]  ;;  %v574_v17 = vld [vmem:[%s3239_s1 + $0x160] sm:$0xff]  ;;  %v575_v18 = vld [vmem:[%s3239_s1 + $0x168] sm:$0xff] }
  0x13   : > { %678 = vmatpush.msra.mxu2 %v584_v11  ;;  %719 = vmatpush.msra.mxu3 %v585_v12  ;;  %v576_v19 = vld [vmem:[%s3239_s1 + $0x170] sm:$0xff]  ;;  %v577_v20 = vld [vmem:[%s3239_s1 + $0x178] sm:$0xff]  ;;  %v570_v21 = vld [vmem:[%s3239_s1 + $0x140] sm:$0xff] }
  0x14   : > { %597 = vmatpush.msra.mxu0 %v578_v13  ;;  %638 = vmatpush.msra.mxu1 %v579_v14  ;;  %v571_v22 = vld [vmem:[%s3239_s1 + $0x148] sm:$0xff]  ;;  %v572_v23 = vld [vmem:[%s3239_s1 + $0x150] sm:$0xff]  ;;  %v573_v24 = vld [vmem:[%s3239_s1 + $0x158] sm:$0xff] }
  0x15   : > { %679 = vmatpush.msra.mxu2 %v580_v15  ;;  %720 = vmatpush.msra.mxu3 %v581_v16  ;;  %v566_v25 = vld [vmem:[%s3239_s1 + $0x120] sm:$0xff]  ;;  %v567_v26 = vld [vmem:[%s3239_s1 + $0x128] sm:$0xff]  ;;  %v568_v27 = vld [vmem:[%s3239_s1 + $0x130] sm:$0xff] }
  0x16   : > { %598 = vmatpush.msra.mxu0 %v574_v17  ;;  %639 = vmatpush.msra.mxu1 %v575_v18  ;;  %v569_v28 = vld [vmem:[%s3239_s1 + $0x138] sm:$0xff]  ;;  %v562_v29 = vld [vmem:[%s3239_s1 + $0x100] sm:$0xff]  ;;  %v563_v30 = vld [vmem:[%s3239_s1 + $0x108] sm:$0xff] }
  0x17   : > { %680 = vmatpush.msra.mxu2 %v576_v19  ;;  %721 = vmatpush.msra.mxu3 %v577_v20  ;;  %v564_v31 = vld [vmem:[%s3239_s1 + $0x110] sm:$0xff]  ;;  %v565_v32 = vld [vmem:[%s3239_s1 + $0x118] sm:$0xff]  ;;  %v558_v33 = vld [vmem:[%s3239_s1 + $0xe0] sm:$0xff] }
  0x18   : > { %599 = vmatpush.msra.mxu0 %v570_v21  ;;  %640 = vmatpush.msra.mxu1 %v571_v22  ;;  %v559_v34 = vld [vmem:[%s3239_s1 + $0xe8] sm:$0xff]  ;;  %v560_v35 = vld [vmem:[%s3239_s1 + $0xf0] sm:$0xff]  ;;  %v561_v36 = vld [vmem:[%s3239_s1 + $0xf8] sm:$0xff] }
  0x19   : > { %681 = vmatpush.msra.mxu2 %v572_v23  ;;  %722 = vmatpush.msra.mxu3 %v573_v24  ;;  %v554_v37 = vld [vmem:[%s3239_s1 + $0xc0] sm:$0xff]  ;;  %v555_v38 = vld [vmem:[%s3239_s1 + $0xc8] sm:$0xff]  ;;  %v556_v39 = vld [vmem:[%s3239_s1 + $0xd0] sm:$0xff] }
  0x1a   : > { %600 = vmatpush.msra.mxu0 %v566_v25  ;;  %641 = vmatpush.msra.mxu1 %v567_v26  ;;  %v557_v40 = vld [vmem:[%s3239_s1 + $0xd8] sm:$0xff]  ;;  %v550_v41 = vld [vmem:[%s3239_s1 + $0xa0] sm:$0xff]  ;;  %v551_v42 = vld [vmem:[%s3239_s1 + $0xa8] sm:$0xff] }
  0x1b   : > { %682 = vmatpush.msra.mxu2 %v568_v27  ;;  %723 = vmatpush.msra.mxu3 %v569_v28  ;;  %v552_v43 = vld [vmem:[%s3239_s1 + $0xb0] sm:$0xff]  ;;  %v553_v44 = vld [vmem:[%s3239_s1 + $0xb8] sm:$0xff]  ;;  %v546_v45 = vld [vmem:[%s3239_s1 + $0x80] sm:$0xff] }
  0x1c   : > { %601 = vmatpush.msra.mxu0 %v562_v29  ;;  %642 = vmatpush.msra.mxu1 %v563_v30  ;;  %v547_v46 = vld [vmem:[%s3239_s1 + $0x88] sm:$0xff]  ;;  %v548_v47 = vld [vmem:[%s3239_s1 + $0x90] sm:$0xff]  ;;  %v549_v48 = vld [vmem:[%s3239_s1 + $0x98] sm:$0xff] }
  0x1d   : > { %683 = vmatpush.msra.mxu2 %v564_v31  ;;  %724 = vmatpush.msra.mxu3 %v565_v32  ;;  %v542_v49 = vld [vmem:[%s3239_s1 + $0x60] sm:$0xff]  ;;  %v543_v50 = vld [vmem:[%s3239_s1 + $0x68] sm:$0xff]  ;;  %v544_v51 = vld [vmem:[%s3239_s1 + $0x70] sm:$0xff] }
  0x1e   : > { %602 = vmatpush.msra.mxu0 %v558_v33  ;;  %643 = vmatpush.msra.mxu1 %v559_v34  ;;  %v545_v52 = vld [vmem:[%s3239_s1 + $0x78] sm:$0xff]  ;;  %v538_v53 = vld [vmem:[%s3239_s1 + $0x40] sm:$0xff]  ;;  %v539_v54 = vld [vmem:[%s3239_s1 + $0x48] sm:$0xff] }
  0x1f   : > { %684 = vmatpush.msra.mxu2 %v560_v35  ;;  %725 = vmatpush.msra.mxu3 %v561_v36  ;;  %v540_v55 = vld [vmem:[%s3239_s1 + $0x50] sm:$0xff]  ;;  %v541_v56 = vld [vmem:[%s3239_s1 + $0x58] sm:$0xff]  ;;  %v534_v57 = vld [vmem:[%s3239_s1 + $0x20] sm:$0xff] }
  0x20   : > { %603 = vmatpush.msra.mxu0 %v554_v37  ;;  %644 = vmatpush.msra.mxu1 %v555_v38  ;;  %v535_v58 = vld [vmem:[%s3239_s1 + $0x28] sm:$0xff]  ;;  %v536_v59 = vld [vmem:[%s3239_s1 + $0x30] sm:$0xff]  ;;  %v537_v60 = vld [vmem:[%s3239_s1 + $0x38] sm:$0xff] }
  0x21   : > { %685 = vmatpush.msra.mxu2 %v556_v39  ;;  %726 = vmatpush.msra.mxu3 %v557_v40  ;;  %v530_v61 = vld [vmem:[%s3239_s1] sm:$0xff]  ;;  %v531_v62 = vld [vmem:[%s3239_s1 + $0x8] sm:$0xff]  ;;  %v532_v63 = vld [vmem:[%s3239_s1 + $0x10] sm:$0xff] }
  0x22   : > { %604 = vmatpush.msra.mxu0 %v550_v41  ;;  %645 = vmatpush.msra.mxu1 %v551_v42  ;;  %v533_v0 = vld [vmem:[%s3239_s1 + $0x18] sm:$0xff]  ;;  %v522_v1 = vld [vmem:[%s2417_s26] sm:$0xff]  ;;  %v523_v2 = vld [vmem:[%s2417_s26 + $0x8] sm:$0xff] }
  0x23   : > { %686 = vmatpush.msra.mxu2 %v552_v43  ;;  %727 = vmatpush.msra.mxu3 %v553_v44  ;;  %v524_v3 = vld [vmem:[%s2417_s26 + $0x10] sm:$0xff]  ;;  %v525_v4 = vld [vmem:[%s2417_s26 + $0x18] sm:$0xff]  ;;  %v526_v5 = vld [vmem:[%s2417_s26 + $0x20] sm:$0xff] }
  0x24   : > { %605 = vmatpush.msra.mxu0 %v546_v45  ;;  %646 = vmatpush.msra.mxu1 %v547_v46  ;;  %v527_v6 = vld [vmem:[%s2417_s26 + $0x28] sm:$0xff]  ;;  %v528_v7 = vld [vmem:[%s2417_s26 + $0x30] sm:$0xff]  ;;  %v529_v8 = vld [vmem:[%s2417_s26 + $0x38] sm:$0xff] }
  0x25   : > { %687 = vmatpush.msra.mxu2 %v548_v47  ;;  %728 = vmatpush.msra.mxu3 %v549_v48  ;;  %v2028_v41 = vld [vmem:[%s3244_s6 + $0x20] sm:$0xff]  ;;  %v1027_v44 = vld [vmem:[%s3240_s2 + $0x1e8] sm:$0xff] }
  0x26   : > { %606 = vmatpush.msra.mxu0 %v542_v49  ;;  %647 = vmatpush.msra.mxu1 %v543_v50  ;;  %v758_v42 = vld [vmem:[%s3244_s6] sm:$0xff]  ;;  %v1023_v46 = vld [vmem:[%s3240_s2 + $0x1c8] sm:$0xff]  ;;  %v1028_v49 = vld [vmem:[%s3240_s2 + $0x1f0] sm:$0xff] }
  0x27   : > { %688 = vmatpush.msra.mxu2 %v544_v51  ;;  %729 = vmatpush.msra.mxu3 %v545_v52  ;;  %v1026_v43 = vld [vmem:[%s3240_s2 + $0x1e0] sm:$0xff]  ;;  %v1029_v50 = vld [vmem:[%s3240_s2 + $0x1f8] sm:$0xff]  ;;  %v2029_v51 = vld [vmem:[%s3244_s6 + $0x28] sm:$0xff] }
  0x28   : > { %607 = vmatpush.msra.mxu0 %v538_v53  ;;  %648 = vmatpush.msra.mxu1 %v539_v54  ;;  %v1022_v45 = vld [vmem:[%s3240_s2 + $0x1c0] sm:$0xff]  ;;  %v759_v52 = vld [vmem:[%s3244_s6 + $0x8] sm:$0xff]  ;;  %v1024_v53 = vld [vmem:[%s3240_s2 + $0x1d0] sm:$0xff] }
  0x29   : > { %689 = vmatpush.msra.mxu2 %v540_v55  ;;  %730 = vmatpush.msra.mxu3 %v541_v56  ;;  %v2040_v47 = vld [vmem:[%s3244_s6 + $0x40] sm:$0xff]  ;;  %v1025_v54 = vld [vmem:[%s3240_s2 + $0x1d8] sm:$0xff]  ;;  %v1019_v56 = vld [vmem:[%s3240_s2 + $0x1a8] sm:$0xff] }
  0x2a   : > { %608 = vmatpush.msra.mxu0 %v534_v57  ;;  %649 = vmatpush.msra.mxu1 %v535_v58  ;;  %v2048_v48 = vld [vmem:[%s3244_s6 + $0x60] sm:$0xff]  ;;  %v1020_v57 = vld [vmem:[%s3240_s2 + $0x1b0] sm:$0xff]  ;;  %v1021_v58 = vld [vmem:[%s3240_s2 + $0x1b8] sm:$0xff] }
  0x2b   : > { %690 = vmatpush.msra.mxu2 %v536_v59  ;;  %731 = vmatpush.msra.mxu3 %v537_v60  ;;  %v1018_v55 = vld [vmem:[%s3240_s2 + $0x1a0] sm:$0xff]  ;;  %v1015_v60 = vld [vmem:[%s3240_s2 + $0x188] sm:$0xff] }
  0x2c   : > { %609 = vmatpush.msra.mxu0 %v530_v61  ;;  %650 = vmatpush.msra.mxu1 %v531_v62  ;;  %v1014_v59 = vld [vmem:[%s3240_s2 + $0x180] sm:$0xff]  ;;  %v1016_v61 = vld [vmem:[%s3240_s2 + $0x190] sm:$0xff]  ;;  %v1017_v62 = vld [vmem:[%s3240_s2 + $0x198] sm:$0xff] }
  0x2d   : > { %691 = vmatpush.msra.mxu2 %v532_v63  ;;  %732 = vmatpush.msra.mxu3 %v533_v0  ;;  %v2041_v63 = vld [vmem:[%s3244_s6 + $0x48] sm:$0xff] }
  0x2e   : > { %610 = vmatmul.f32.vlgmr.msra.gmra.mxu0 %v522_v1  ;;  %651 = vmatmul.f32.vlgmr.msra.gmra.mxu1 %v522_v1  ;;  %v2049_v0 = vld [vmem:[%s3244_s6 + $0x68] sm:$0xff] }
  0x2f   : > { %692 = vmatmul.f32.vlgmr.msra.gmra.mxu2 %v522_v1  ;;  %733 = vmatmul.f32.vlgmr.msra.gmra.mxu3 %v522_v1  ;;  %v1010_v1 = vld [vmem:[%s3240_s2 + $0x160] sm:$0xff] }
  0x36   : > { %613 = vmatmul.f32.gmra.mxu0 %v523_v2  ;;  %654 = vmatmul.f32.gmra.mxu1 %v523_v2 }
  0x37   : > { %695 = vmatmul.f32.gmra.mxu2 %v523_v2  ;;  %736 = vmatmul.f32.gmra.mxu3 %v523_v2  ;;  %v1011_v2 = vld [vmem:[%s3240_s2 + $0x168] sm:$0xff] }
  0x3e   : > { %616 = vmatmul.f32.gmra.mxu0 %v524_v3  ;;  %657 = vmatmul.f32.gmra.mxu1 %v524_v3 }
  0x3f   : > { %698 = vmatmul.f32.gmra.mxu2 %v524_v3  ;;  %739 = vmatmul.f32.gmra.mxu3 %v524_v3  ;;  %v2030_v3 = vld [vmem:[%s3244_s6 + $0x30] sm:$0xff] }
  0x46   : > { %619 = vmatmul.f32.gmra.mxu0 %v525_v4  ;;  %660 = vmatmul.f32.gmra.mxu1 %v525_v4 }
  0x47   : > { %701 = vmatmul.f32.gmra.mxu2 %v525_v4  ;;  %742 = vmatmul.f32.gmra.mxu3 %v525_v4  ;;  %v760_v4 = vld [vmem:[%s3244_s6 + $0x10] sm:$0xff] }
  0x4e   : > { %622 = vmatmul.f32.gmra.mxu0 %v526_v5  ;;  %663 = vmatmul.f32.gmra.mxu1 %v526_v5 }
  0x4f   : > { %704 = vmatmul.f32.gmra.mxu2 %v526_v5  ;;  %745 = vmatmul.f32.gmra.mxu3 %v526_v5  ;;  %v1012_v5 = vld [vmem:[%s3240_s2 + $0x170] sm:$0xff] }
  0x56   : > { %625 = vmatmul.f32.gmra.mxu0 %v527_v6  ;;  %666 = vmatmul.f32.gmra.mxu1 %v527_v6 }
  0x57   : > { %707 = vmatmul.f32.gmra.mxu2 %v527_v6  ;;  %748 = vmatmul.f32.gmra.mxu3 %v527_v6  ;;  %v1013_v6 = vld [vmem:[%s3240_s2 + $0x178] sm:$0xff] }
  0x5e   : > { %628 = vmatmul.f32.gmra.mxu0 %v528_v7  ;;  %669 = vmatmul.f32.gmra.mxu1 %v528_v7 }
  0x5f   : > { %710 = vmatmul.f32.gmra.mxu2 %v528_v7  ;;  %751 = vmatmul.f32.gmra.mxu3 %v528_v7  ;;  %v1006_v7 = vld [vmem:[%s3240_s2 + $0x140] sm:$0xff] }
  0x66   : > { %631 = vmatmul.f32.gmra.mxu0 %v529_v8  ;;  %672 = vmatmul.f32.gmra.mxu1 %v529_v8 }
  0x67   : > { %713 = vmatmul.f32.gmra.mxu2 %v529_v8  ;;  %754 = vmatmul.f32.gmra.mxu3 %v529_v8  ;;  %v1007_v8 = vld [vmem:[%s3240_s2 + $0x148] sm:$0xff] }
  0xab   : > { %v611_v9 = vpop.f32.mrf.mxu0  ;;  %v652_v10 = vpop.f32.mrf.mxu1 }
  0xb2   : > { %v2439_v11 = vpop.f32.mrf.mxu2  ;;  %v2441_v12 = vpop.f32.mrf.mxu3 }
  0xb3   : > { %v614_v13 = vpop.f32.mrf.mxu0  ;;  %v655_v14 = vpop.f32.mrf.mxu1 }
  0xba   : > { %v2443_v15 = vpop.f32.mrf.mxu2  ;;  %v2445_v16 = vpop.f32.mrf.mxu3 }
  0xbb   : > { %v617_v17 = vpop.f32.mrf.mxu0  ;;  %v658_v18 = vpop.f32.mrf.mxu1 }
  0xc2   : > { %v699_v19 = vpop.f32.mrf.mxu2  ;;  %v740_v20 = vpop.f32.mrf.mxu3 }
  0xc3   : > { %v620_v21 = vpop.f32.mrf.mxu0  ;;  %v661_v22 = vpop.f32.mrf.mxu1 }
  0xca   : > { %v702_v23 = vpop.f32.mrf.mxu2  ;;  %v743_v24 = vpop.f32.mrf.mxu3 }
  0xcb   : > { %v623_v25 = vpop.f32.mrf.mxu0  ;;  %v664_v26 = vpop.f32.mrf.mxu1 }
  0xd2   : > { %v705_v27 = vpop.f32.mrf.mxu2  ;;  %v746_v28 = vpop.f32.mrf.mxu3 }
  0xd3   : > { %v626_v29 = vpop.f32.mrf.mxu0  ;;  %v667_v30 = vpop.f32.mrf.mxu1 }
  0xda   : > { %v708_v31 = vpop.f32.mrf.mxu2  ;;  %v749_v32 = vpop.f32.mrf.mxu3 }
  0xdb   : > { %v629_v33 = vpop.f32.mrf.mxu0  ;;  %v670_v34 = vpop.f32.mrf.mxu1 }
  0xe2   : > { %v711_v35 = vpop.f32.mrf.mxu2  ;;  %v752_v36 = vpop.f32.mrf.mxu3 }
  0xe3   : > { %v632_v37 = vpop.f32.mrf.mxu0  ;;  %v673_v38 = vpop.f32.mrf.mxu1 }
  0xe4   : > { %788 = vmatpush.msrb.mxu0 %v673_v38  ;;  %829 = vmatpush.msrb.mxu1 %v632_v37  ;;  %v982_v37 = vld [vmem:[%s3240_s2 + $0x80] sm:$0xff]  ;;  %v983_v38 = vld [vmem:[%s3240_s2 + $0x88] sm:$0xff] }
  0xe6   : > { %789 = vmatpush.msrb.mxu0 %v670_v34  ;;  %830 = vmatpush.msrb.mxu1 %v629_v33  ;;  %v986_v33 = vld [vmem:[%s3240_s2 + $0xa0] sm:$0xff]  ;;  %v987_v34 = vld [vmem:[%s3240_s2 + $0xa8] sm:$0xff] }
  0xe8   : > { %790 = vmatpush.msrb.mxu0 %v667_v30  ;;  %831 = vmatpush.msrb.mxu1 %v626_v29  ;;  %v990_v29 = vld [vmem:[%s3240_s2 + $0xc0] sm:$0xff]  ;;  %v991_v30 = vld [vmem:[%s3240_s2 + $0xc8] sm:$0xff] }
  0xea   : > { %v714_v39 = vpop.f32.mrf.mxu2  ;;  %v755_v40 = vpop.f32.mrf.mxu3  ;;  %791 = vmatpush.msrb.mxu0 %v664_v26  ;;  %832 = vmatpush.msrb.mxu1 %v623_v25  ;;  %v996_v25 = vld [vmem:[%s3240_s2 + $0xf0] sm:$0xff]  ;;  %v997_v26 = vld [vmem:[%s3240_s2 + $0xf8] sm:$0xff] }
  0xeb   : > { %875 = vmatpush.msrb.mxu2 %v714_v39  ;;  %925 = vmatpush.msrb.mxu3 %v755_v40  ;;  %v984_v39 = vld [vmem:[%s3240_s2 + $0x90] sm:$0xff]  ;;  %v985_v40 = vld [vmem:[%s3240_s2 + $0x98] sm:$0xff] }
  0xec   : > { %792 = vmatpush.msrb.mxu0 %v661_v22  ;;  %833 = vmatpush.msrb.mxu1 %v620_v21  ;;  %v1000_v21 = vld [vmem:[%s3240_s2 + $0x110] sm:$0xff]  ;;  %v1001_v22 = vld [vmem:[%s3240_s2 + $0x118] sm:$0xff] }
  0xed   : > { %876 = vmatpush.msrb.mxu2 %v711_v35  ;;  %926 = vmatpush.msrb.mxu3 %v752_v36  ;;  %v988_v35 = vld [vmem:[%s3240_s2 + $0xb0] sm:$0xff]  ;;  %v989_v36 = vld [vmem:[%s3240_s2 + $0xb8] sm:$0xff] }
  0xee   : > { %793 = vmatpush.msrb.mxu0 %v658_v18  ;;  %834 = vmatpush.msrb.mxu1 %v617_v17  ;;  %v998_v17 = vld [vmem:[%s3240_s2 + $0x100] sm:$0xff]  ;;  %v999_v18 = vld [vmem:[%s3240_s2 + $0x108] sm:$0xff] }
  0xef   : > { %877 = vmatpush.msrb.mxu2 %v708_v31  ;;  %927 = vmatpush.msrb.mxu3 %v749_v32  ;;  %v992_v31 = vld [vmem:[%s3240_s2 + $0xd0] sm:$0xff]  ;;  %v993_v32 = vld [vmem:[%s3240_s2 + $0xd8] sm:$0xff] }
  0xf0   : > { %794 = vmatpush.msrb.mxu0 %v655_v14  ;;  %835 = vmatpush.msrb.mxu1 %v614_v13  ;;  %v1004_v13 = vld [vmem:[%s3240_s2 + $0x130] sm:$0xff]  ;;  %v1005_v14 = vld [vmem:[%s3240_s2 + $0x138] sm:$0xff] }
  0xf1   : > { %878 = vmatpush.msrb.mxu2 %v705_v27  ;;  %928 = vmatpush.msrb.mxu3 %v746_v28  ;;  %v2043_v27 = vld [vmem:[%s3244_s6 + $0x58] sm:$0xff] }
  0xf2   : > { %795 = vmatpush.msrb.mxu0 %v652_v10  ;;  %836 = vmatpush.msrb.mxu1 %v611_v9  ;;  %v1008_v9 = vld [vmem:[%s3240_s2 + $0x150] sm:$0xff]  ;;  %v1009_v10 = vld [vmem:[%s3240_s2 + $0x158] sm:$0xff] }
  0xf3   : > { %879 = vmatpush.msrb.mxu2 %v702_v23  ;;  %929 = vmatpush.msrb.mxu3 %v743_v24  ;;  %v994_v23 = vld [vmem:[%s3240_s2 + $0xe0] sm:$0xff]  ;;  %v995_v24 = vld [vmem:[%s3240_s2 + $0xe8] sm:$0xff]  ;;  %v2051_v28 = vld [vmem:[%s3244_s6 + $0x78] sm:$0xff] }
  0xf4   : > { %2032 = vmatmul.msk.f32.vlgmr.msrb.gmra.mxu0 %vm767_vm0, %v2028_v41  ;;  %2036 = vmatmul.msk.f32.vlgmr.msrb.gmra.mxu1 %vm767_vm0, %v758_v42  ;;  %v978_v41 = vld [vmem:[%s3240_s2 + $0x60] sm:$0xff]  ;;  %v979_v42 = vld [vmem:[%s3240_s2 + $0x68] sm:$0xff] }
  0xf5   : > { %880 = vmatpush.msrb.mxu2 %v699_v19  ;;  %930 = vmatpush.msrb.mxu3 %v740_v20  ;;  %v2031_v19 = vld [vmem:[%s3244_s6 + $0x38] sm:$0xff] }
  0xf6   : > { %1030 = vmatpush.msra.mxu0 %v1026_v43  ;;  %1059 = vmatpush.msra.mxu1 %v1027_v44  ;;  %v761_v20 = vld [vmem:[%s3244_s6 + $0x18] sm:$0xff]  ;;  %v980_v43 = vld [vmem:[%s3240_s2 + $0x70] sm:$0xff] }
  0xf7   : > { %881 = vmatpush.msrb.mxu2 %v2443_v15  ;;  %931 = vmatpush.msrb.mxu3 %v2445_v16  ;;  %v2042_v15 = vld [vmem:[%s3244_s6 + $0x50] sm:$0xff]  ;;  %v981_v44 = vld [vmem:[%s3240_s2 + $0x78] sm:$0xff] }
  0xf8   : > { %1031 = vmatpush.msra.mxu0 %v1022_v45  ;;  %1060 = vmatpush.msra.mxu1 %v1023_v46  ;;  %v2050_v16 = vld [vmem:[%s3244_s6 + $0x70] sm:$0xff]  ;;  %v974_v45 = vld [vmem:[%s3240_s2 + $0x40] sm:$0xff]  ;;  %v975_v46 = vld [vmem:[%s3240_s2 + $0x48] sm:$0xff] }
  0xf9   : > { %882 = vmatpush.msrb.mxu2 %v2439_v11  ;;  %932 = vmatpush.msrb.mxu3 %v2441_v12  ;;  %v1002_v11 = vld [vmem:[%s3240_s2 + $0x120] sm:$0xff]  ;;  %v1003_v12 = vld [vmem:[%s3240_s2 + $0x128] sm:$0xff] }
  0xfa   : > { %2044 = vmatmul.msk.f32.vlgmr.msrb.gmra.mxu2 %vm767_vm0, %v2040_v47  ;;  %2052 = vmatmul.msk.f32.vlgmr.msrb.gmra.mxu3 %vm767_vm0, %v2048_v48  ;;  %v976_v47 = vld [vmem:[%s3240_s2 + $0x50] sm:$0xff]  ;;  %v977_v48 = vld [vmem:[%s3240_s2 + $0x58] sm:$0xff] }
  0xfb   : > { %1088 = vmatpush.msra.mxu2 %v1028_v49  ;;  %1117 = vmatpush.msra.mxu3 %v1029_v50  ;;  %v970_v49 = vld [vmem:[%s3240_s2 + $0x20] sm:$0xff]  ;;  %v971_v50 = vld [vmem:[%s3240_s2 + $0x28] sm:$0xff] }
  0xfc   : > { %2033 = vmatmul.msk.f32.gmra.mxu0 %vm767_vm0, %v2029_v51  ;;  %2037 = vmatmul.msk.f32.gmra.mxu1 %vm767_vm0, %v759_v52  ;;  %v972_v51 = vld [vmem:[%s3240_s2 + $0x30] sm:$0xff]  ;;  %v973_v52 = vld [vmem:[%s3240_s2 + $0x38] sm:$0xff] }
  0xfd   : > { %1089 = vmatpush.msra.mxu2 %v1024_v53  ;;  %1118 = vmatpush.msra.mxu3 %v1025_v54  ;;  %v966_v53 = vld [vmem:[%s3240_s2] sm:$0xff]  ;;  %v967_v54 = vld [vmem:[%s3240_s2 + $0x8] sm:$0xff] }
  0xfe   : > { %1032 = vmatpush.msra.mxu0 %v1018_v55  ;;  %1061 = vmatpush.msra.mxu1 %v1019_v56  ;;  %v968_v55 = vld [vmem:[%s3240_s2 + $0x10] sm:$0xff]  ;;  %v969_v56 = vld [vmem:[%s3240_s2 + $0x18] sm:$0xff] }
  0xff   : > { %1090 = vmatpush.msra.mxu2 %v1020_v57  ;;  %1119 = vmatpush.msra.mxu3 %v1021_v58 }
 0x100   : > { %1033 = vmatpush.msra.mxu0 %v1014_v59  ;;  %1062 = vmatpush.msra.mxu1 %v1015_v60 }
 0x101   : > { %1091 = vmatpush.msra.mxu2 %v1016_v61  ;;  %1120 = vmatpush.msra.mxu3 %v1017_v62 }
 0x102   : > { %2045 = vmatmul.msk.f32.gmra.mxu2 %vm767_vm0, %v2041_v63  ;;  %2053 = vmatmul.msk.f32.gmra.mxu3 %vm767_vm0, %v2049_v0 }
 0x103   : > { %1034 = vmatpush.msra.mxu0 %v1010_v1  ;;  %1063 = vmatpush.msra.mxu1 %v1011_v2  ;;  %v2109_v1 = vld [vmem:[%s3249_s11] ss:$0 sm:$0xff] }
 0x104   : > { %2034 = vmatmul.msk.f32.gmra.mxu0 %vm767_vm0, %v2030_v3  ;;  %2038 = vmatmul.msk.f32.gmra.mxu1 %vm767_vm0, %v760_v4 }
 0x105   : > { %1092 = vmatpush.msra.mxu2 %v1012_v5  ;;  %1121 = vmatpush.msra.mxu3 %v1013_v6 }
 0x106   : > { %1035 = vmatpush.msra.mxu0 %v1006_v7  ;;  %1064 = vmatpush.msra.mxu1 %v1007_v8 }
 0x107   : > { %1093 = vmatpush.msra.mxu2 %v1008_v9  ;;  %1122 = vmatpush.msra.mxu3 %v1009_v10 }
 0x108   : > { %1036 = vmatpush.msra.mxu0 %v1002_v11  ;;  %1065 = vmatpush.msra.mxu1 %v1003_v12 }
 0x109   : > { %1094 = vmatpush.msra.mxu2 %v1004_v13  ;;  %1123 = vmatpush.msra.mxu3 %v1005_v14 }
 0x10a   : > { %2046 = vmatmul.msk.f32.gmra.mxu2 %vm767_vm0, %v2042_v15  ;;  %2054 = vmatmul.msk.f32.gmra.mxu3 %vm767_vm0, %v2050_v16 }
 0x10b   : > { %1037 = vmatpush.msra.mxu0 %v998_v17  ;;  %1066 = vmatpush.msra.mxu1 %v999_v18 }
 0x10c   : > { %2035 = vmatmul.msk.f32.gmra.mxu0 %vm767_vm0, %v2031_v19  ;;  %2039 = vmatmul.msk.f32.gmra.mxu1 %vm767_vm0, %v761_v20 }
 0x10d   : > { %1095 = vmatpush.msra.mxu2 %v1000_v21  ;;  %1124 = vmatpush.msra.mxu3 %v1001_v22 }
 0x10e   : > { %1038 = vmatpush.msra.mxu0 %v994_v23  ;;  %1067 = vmatpush.msra.mxu1 %v995_v24 }
 0x10f   : > { %1096 = vmatpush.msra.mxu2 %v996_v25  ;;  %1125 = vmatpush.msra.mxu3 %v997_v26 }
 0x110   : > { %1039 = vmatpush.msra.mxu0 %v990_v29  ;;  %1068 = vmatpush.msra.mxu1 %v991_v30 }
 0x111   : > { %1097 = vmatpush.msra.mxu2 %v992_v31  ;;  %1126 = vmatpush.msra.mxu3 %v993_v32 }
 0x112   : > { %2047 = vmatmul.msk.f32.gmra.mxu2 %vm767_vm0, %v2043_v27  ;;  %2055 = vmatmul.msk.f32.gmra.mxu3 %vm767_vm0, %v2051_v28 }
 0x113   : > { %1040 = vmatpush.msra.mxu0 %v986_v33  ;;  %1069 = vmatpush.msra.mxu1 %v987_v34 }
 0x114   : > { %1098 = vmatpush.msra.mxu2 %v988_v35  ;;  %1127 = vmatpush.msra.mxu3 %v989_v36 }
 0x115   : > { %1041 = vmatpush.msra.mxu0 %v982_v37  ;;  %1070 = vmatpush.msra.mxu1 %v983_v38 }
 0x116   : > { %1099 = vmatpush.msra.mxu2 %v984_v39  ;;  %1128 = vmatpush.msra.mxu3 %v985_v40 }
 0x117   : > { %1042 = vmatpush.msra.mxu0 %v978_v41  ;;  %1071 = vmatpush.msra.mxu1 %v979_v42 }
 0x118   : > { %1100 = vmatpush.msra.mxu2 %v980_v43  ;;  %1129 = vmatpush.msra.mxu3 %v981_v44 }
 0x119   : > { %1043 = vmatpush.msra.mxu0 %v974_v45  ;;  %1072 = vmatpush.msra.mxu1 %v975_v46 }
 0x11a   : > { %1101 = vmatpush.msra.mxu2 %v976_v47  ;;  %1130 = vmatpush.msra.mxu3 %v977_v48  ;;  %v2056_v48 = vld [vmem:[%s3245_s7 + $0x10] sm:$0xff] }
 0x11b   : > { %1044 = vmatpush.msra.mxu0 %v970_v49  ;;  %1073 = vmatpush.msra.mxu1 %v971_v50  ;;  %v1146_v49 = vld [vmem:[%s3245_s7] sm:$0xff] }
 0x11c   : > { %1102 = vmatpush.msra.mxu2 %v972_v51  ;;  %1131 = vmatpush.msra.mxu3 %v973_v52  ;;  %v1348_v52 = vld [vmem:[%s3241_s3 + $0x1e0] sm:$0xff] }
 0x11d   : > { %1045 = vmatpush.msra.mxu0 %v966_v53  ;;  %1074 = vmatpush.msra.mxu1 %v967_v54  ;;  %v1349_v53 = vld [vmem:[%s3241_s3 + $0x1e8] sm:$0xff]  ;;  %v1344_v54 = vld [vmem:[%s3241_s3 + $0x1c0] sm:$0xff] }
 0x11e   : > { %1103 = vmatpush.msra.mxu2 %v968_v55  ;;  %1132 = vmatpush.msra.mxu3 %v969_v56  ;;  %v1345_v55 = vld [vmem:[%s3241_s3 + $0x1c8] sm:$0xff]  ;;  %v2062_v56 = vld [vmem:[%s3245_s7 + $0x20] sm:$0xff] }
 0x171   : > { %v797_v57 = vpop.f32.mrf.mxu0  ;;  %v838_v58 = vpop.f32.mrf.mxu1 }
 0x172   : > { %v839_v59 = vadd.f32 %v838_v58, %v797_v57  ;;  %v2066_v57 = vld [vmem:[%s3245_s7 + $0x30] sm:$0xff] }
 0x173   : > { %v1350_v58 = vld [vmem:[%s3241_s3 + $0x1f0] sm:$0xff] }
 0x179   : > { %v800_v60 = vpop.f32.mrf.mxu0  ;;  %v841_v61 = vpop.f32.mrf.mxu1 }
 0x17a   : > { %v842_v4 = vadd.f32 %v841_v61, %v800_v60  ;;  %v2057_v60 = vld [vmem:[%s3245_s7 + $0x18] sm:$0xff]  ;;  %v1147_v61 = vld [vmem:[%s3245_s7 + $0x8] sm:$0xff] }
 0x17d   : > { %v884_v62 = vpop.f32.mrf.mxu2  ;;  %v934_v63 = vpop.f32.mrf.mxu3 }
 0x17e   : > { %v896_v0 = vadd.f32 %v884_v62, %v839_v59  ;;  %v1351_v59 = vld [vmem:[%s3241_s3 + $0x1f8] sm:$0xff]  ;;  %v1346_v62 = vld [vmem:[%s3241_s3 + $0x1d0] sm:$0xff] }
 0x180   : > { %v946_v2 = vadd.f32 %v934_v63, %v896_v0  ;;  %v1347_v63 = vld [vmem:[%s3241_s3 + $0x1d8] sm:$0xff]  ;;  %v1340_v0 = vld [vmem:[%s3241_s3 + $0x1a0] sm:$0xff] }
 0x181   : > { %v803_v6 = vpop.f32.mrf.mxu0  ;;  %v844_v7 = vpop.f32.mrf.mxu1 }
 0x182   : > { %v954_v3 = vadd.f32 %v2109_v1, %v946_v2  ;;  %v845_v14 = vadd.f32 %v844_v7, %v803_v6  ;;  %v1342_v2 = vld [vmem:[%s3241_s3 + $0x1b0] sm:$0xff]  ;;  %v1339_v7 = vld [vmem:[%s3241_s3 + $0x198] sm:$0xff] }
 0x183   : > { %v1338_v6 = vld [vmem:[%s3241_s3 + $0x190] sm:$0xff] }
 0x184   : > { %v958_v5 = vmul.f32 0.2, %v954_v3 }
 0x185   : > { %v887_v8 = vpop.f32.mrf.mxu2  ;;  %v937_v9 = vpop.f32.mrf.mxu3 }
 0x186   : > { %v962_v10 = vmax.f32 %v954_v3, %v958_v5  ;;  %v897_v11 = vadd.f32 %v887_v8, %v842_v4  ;;  %v1343_v3 = vld [vmem:[%s3241_s3 + $0x1b8] sm:$0xff]  ;;  %v1336_v4 = vld [vmem:[%s3241_s3 + $0x180] sm:$0xff]  ;;  %v1337_v5 = vld [vmem:[%s3241_s3 + $0x188] sm:$0xff] }
 0x187   : > { %v2063_v8 = vld [vmem:[%s3245_s7 + $0x28] sm:$0xff] }
 0x188   : > { %v947_v12 = vadd.f32 %v937_v9, %v897_v11  ;;  %1046 = vmatmul.f32.vlgmr.msra.gmra.mxu0 %v962_v10  ;;  %1075 = vmatmul.f32.vlgmr.msra.gmra.mxu1 %v962_v10  ;;  %v2067_v9 = vld [vmem:[%s3245_s7 + $0x38] sm:$0xff]  ;;  %v1333_v11 = vld [vmem:[%s3241_s3 + $0x168] sm:$0xff] }
 0x189   : > { %1104 = vmatmul.f32.vlgmr.msra.gmra.mxu2 %v962_v10  ;;  %1133 = vmatmul.f32.vlgmr.msra.gmra.mxu3 %v962_v10  ;;  %v806_v20 = vpop.f32.mrf.mxu0  ;;  %v847_v21 = vpop.f32.mrf.mxu1  ;;  %v1332_v10 = vld [vmem:[%s3241_s3 + $0x160] sm:$0xff] }
 0x18a   : > { %v955_v13 = vadd.f32 %v2109_v1, %v947_v12  ;;  %v848_v24 = vadd.f32 %v847_v21, %v806_v20  ;;  %v1334_v12 = vld [vmem:[%s3241_s3 + $0x170] sm:$0xff]  ;;  %v1327_v21 = vld [vmem:[%s3241_s3 + $0x138] sm:$0xff] }
 0x18b   : > { %v1326_v20 = vld [vmem:[%s3241_s3 + $0x130] sm:$0xff] }
 0x18c   : > { %v959_v15 = vmul.f32 0.2, %v955_v13 }
 0x18d   : > { %v890_v16 = vpop.f32.mrf.mxu2  ;;  %v940_v17 = vpop.f32.mrf.mxu3 }
 0x18e   : > { %v963_v18 = vmax.f32 %v955_v13, %v959_v15  ;;  %v898_v19 = vadd.f32 %v890_v16, %v845_v14  ;;  %v1335_v13 = vld [vmem:[%s3241_s3 + $0x178] sm:$0xff]  ;;  %v1328_v14 = vld [vmem:[%s3241_s3 + $0x140] sm:$0xff]  ;;  %v1329_v15 = vld [vmem:[%s3241_s3 + $0x148] sm:$0xff] }
 0x18f   : > { %v1330_v16 = vld [vmem:[%s3241_s3 + $0x150] sm:$0xff] }
 0x190   : > { %v948_v22 = vadd.f32 %v940_v17, %v898_v19  ;;  %1049 = vmatmul.f32.gmra.mxu0 %v963_v18  ;;  %1078 = vmatmul.f32.gmra.mxu1 %v963_v18  ;;  %v1331_v17 = vld [vmem:[%s3241_s3 + $0x158] sm:$0xff]  ;;  %v1325_v19 = vld [vmem:[%s3241_s3 + $0x128] sm:$0xff] }
 0x191   : > { %1107 = vmatmul.f32.gmra.mxu2 %v963_v18  ;;  %1136 = vmatmul.f32.gmra.mxu3 %v963_v18  ;;  %v1324_v18 = vld [vmem:[%s3241_s3 + $0x120] sm:$0xff] }
 0x192   : > { %v956_v23 = vadd.f32 %v2109_v1, %v948_v22  ;;  %v1320_v22 = vld [vmem:[%s3241_s3 + $0x100] sm:$0xff] }
 0x194   : > { %v960_v25 = vmul.f32 0.2, %v956_v23 }
 0x195   : > { %v893_v26 = vpop.f32.mrf.mxu2  ;;  %v943_v27 = vpop.f32.mrf.mxu3 }
 0x196   : > { %v964_v28 = vmax.f32 %v956_v23, %v960_v25  ;;  %v899_v29 = vadd.f32 %v893_v26, %v848_v24  ;;  %v1321_v23 = vld [vmem:[%s3241_s3 + $0x108] sm:$0xff]  ;;  %v1322_v24 = vld [vmem:[%s3241_s3 + $0x110] sm:$0xff]  ;;  %v1323_v25 = vld [vmem:[%s3241_s3 + $0x118] sm:$0xff] }
 0x197   : > { %v1316_v26 = vld [vmem:[%s3241_s3 + $0xe0] sm:$0xff] }
 0x198   : > { %v949_v30 = vadd.f32 %v943_v27, %v899_v29  ;;  %1052 = vmatmul.f32.gmra.mxu0 %v964_v28  ;;  %1081 = vmatmul.f32.gmra.mxu1 %v964_v28  ;;  %v1317_v27 = vld [vmem:[%s3241_s3 + $0xe8] sm:$0xff]  ;;  %v1319_v29 = vld [vmem:[%s3241_s3 + $0xf8] sm:$0xff] }
 0x199   : > { %1110 = vmatmul.f32.gmra.mxu2 %v964_v28  ;;  %1139 = vmatmul.f32.gmra.mxu3 %v964_v28  ;;  %v1318_v28 = vld [vmem:[%s3241_s3 + $0xf0] sm:$0xff] }
 0x19a   : > { %v957_v31 = vadd.f32 %v2109_v1, %v949_v30  ;;  %v1341_v1 = vld [vmem:[%s3241_s3 + $0x1a8] sm:$0xff]  ;;  %v1312_v30 = vld [vmem:[%s3241_s3 + $0xc0] sm:$0xff] }
 0x19c   : > { %v961_v32 = vmul.f32 0.2, %v957_v31 }
 0x19e   : > { %v965_v33 = vmax.f32 %v957_v31, %v961_v32  ;;  %v1313_v31 = vld [vmem:[%s3241_s3 + $0xc8] sm:$0xff]  ;;  %v1314_v32 = vld [vmem:[%s3241_s3 + $0xd0] sm:$0xff] }
 0x1a0   : > { %1055 = vmatmul.f32.gmra.mxu0 %v965_v33  ;;  %1084 = vmatmul.f32.gmra.mxu1 %v965_v33 }
 0x1a1   : > { %1113 = vmatmul.f32.gmra.mxu2 %v965_v33  ;;  %1142 = vmatmul.f32.gmra.mxu3 %v965_v33  ;;  %v1315_v33 = vld [vmem:[%s3241_s3 + $0xd8] sm:$0xff] }
 0x205   : > { %v1047_v34 = vpop.f32.mrf.mxu0  ;;  %v1076_v35 = vpop.f32.mrf.mxu1 }
 0x20c   : > { %v1105_v36 = vpop.f32.mrf.mxu2  ;;  %v1134_v37 = vpop.f32.mrf.mxu3 }
 0x20d   : > { %v1050_v38 = vpop.f32.mrf.mxu0  ;;  %v1079_v39 = vpop.f32.mrf.mxu1 }
 0x214   : > { %v1108_v40 = vpop.f32.mrf.mxu2  ;;  %v1137_v41 = vpop.f32.mrf.mxu3 }
 0x215   : > { %v1053_v42 = vpop.f32.mrf.mxu0  ;;  %v1082_v43 = vpop.f32.mrf.mxu1 }
 0x21c   : > { %v1111_v44 = vpop.f32.mrf.mxu2  ;;  %v1140_v45 = vpop.f32.mrf.mxu3 }
 0x21d   : > { %v1056_v46 = vpop.f32.mrf.mxu0  ;;  %v1085_v47 = vpop.f32.mrf.mxu1 }
 0x21e   : > { %1170 = vmatpush.msrb.mxu0 %v1085_v47  ;;  %1199 = vmatpush.msrb.mxu1 %v1056_v46  ;;  %v1296_v46 = vld [vmem:[%s3241_s3 + $0x40] sm:$0xff]  ;;  %v1297_v47 = vld [vmem:[%s3241_s3 + $0x48] sm:$0xff] }
 0x220   : > { %1171 = vmatpush.msrb.mxu0 %v1082_v43  ;;  %1200 = vmatpush.msrb.mxu1 %v1053_v42  ;;  %v1300_v42 = vld [vmem:[%s3241_s3 + $0x60] sm:$0xff]  ;;  %v1301_v43 = vld [vmem:[%s3241_s3 + $0x68] sm:$0xff] }
 0x222   : > { %1172 = vmatpush.msrb.mxu0 %v1079_v39  ;;  %1201 = vmatpush.msrb.mxu1 %v1050_v38  ;;  %v1304_v38 = vld [vmem:[%s3241_s3 + $0x80] sm:$0xff]  ;;  %v1305_v39 = vld [vmem:[%s3241_s3 + $0x88] sm:$0xff] }
 0x224   : > { %v1114_v50 = vpop.f32.mrf.mxu2  ;;  %v1143_v51 = vpop.f32.mrf.mxu3  ;;  %1173 = vmatpush.msrb.mxu0 %v1076_v35  ;;  %1202 = vmatpush.msrb.mxu1 %v1047_v34  ;;  %v1308_v34 = vld [vmem:[%s3241_s3 + $0xa0] sm:$0xff]  ;;  %v1309_v35 = vld [vmem:[%s3241_s3 + $0xa8] sm:$0xff] }
 0x225   : > { %1231 = vmatpush.msrb.mxu2 %v1114_v50  ;;  %1265 = vmatpush.msrb.mxu3 %v1143_v51  ;;  %v1292_v50 = vld [vmem:[%s3241_s3 + $0x20] sm:$0xff]  ;;  %v1293_v51 = vld [vmem:[%s3241_s3 + $0x28] sm:$0xff] }
 0x226   : > { %2058 = vmatmul.msk.f32.vlgmr.msrb.gmra.mxu0 %vm1151_vm1, %v2056_v48  ;;  %2060 = vmatmul.msk.f32.vlgmr.msrb.gmra.mxu1 %vm1151_vm1, %v1146_v49  ;;  %v1298_v48 = vld [vmem:[%s3241_s3 + $0x50] sm:$0xff]  ;;  %v1299_v49 = vld [vmem:[%s3241_s3 + $0x58] sm:$0xff] }
 0x227   : > { %1232 = vmatpush.msrb.mxu2 %v1111_v44  ;;  %1266 = vmatpush.msrb.mxu3 %v1140_v45  ;;  %v1302_v44 = vld [vmem:[%s3241_s3 + $0x70] sm:$0xff]  ;;  %v1303_v45 = vld [vmem:[%s3241_s3 + $0x78] sm:$0xff] }
 0x228   : > { %1352 = vmatpush.msra.mxu0 %v1348_v52  ;;  %1375 = vmatpush.msra.mxu1 %v1349_v53  ;;  %v1294_v52 = vld [vmem:[%s3241_s3 + $0x30] sm:$0xff]  ;;  %v1295_v53 = vld [vmem:[%s3241_s3 + $0x38] sm:$0xff] }
 0x229   : > { %1233 = vmatpush.msrb.mxu2 %v1108_v40  ;;  %1267 = vmatpush.msrb.mxu3 %v1137_v41  ;;  %v1306_v40 = vld [vmem:[%s3241_s3 + $0x90] sm:$0xff]  ;;  %v1307_v41 = vld [vmem:[%s3241_s3 + $0x98] sm:$0xff] }
 0x22a   : > { %1353 = vmatpush.msra.mxu0 %v1344_v54  ;;  %1376 = vmatpush.msra.mxu1 %v1345_v55  ;;  %v1288_v54 = vld [vmem:[%s3241_s3] sm:$0xff]  ;;  %v1289_v55 = vld [vmem:[%s3241_s3 + $0x8] sm:$0xff] }
 0x22b   : > { %1234 = vmatpush.msrb.mxu2 %v1105_v36  ;;  %1268 = vmatpush.msrb.mxu3 %v1134_v37  ;;  %v1310_v36 = vld [vmem:[%s3241_s3 + $0xb0] sm:$0xff]  ;;  %v1311_v37 = vld [vmem:[%s3241_s3 + $0xb8] sm:$0xff] }
 0x22c   : > { %2064 = vmatmul.msk.f32.vlgmr.msrb.gmra.mxu2 %vm1151_vm1, %v2062_v56  ;;  %2068 = vmatmul.msk.f32.vlgmr.msrb.gmra.mxu3 %vm1151_vm1, %v2066_v57  ;;  %v1290_v56 = vld [vmem:[%s3241_s3 + $0x10] sm:$0xff]  ;;  %v1291_v57 = vld [vmem:[%s3241_s3 + $0x18] sm:$0xff] }
 0x22d   : > { %1398 = vmatpush.msra.mxu2 %v1350_v58  ;;  %1421 = vmatpush.msra.mxu3 %v1351_v59 }
 0x22e   : > { %2059 = vmatmul.msk.f32.gmra.mxu0 %vm1151_vm1, %v2057_v60  ;;  %2061 = vmatmul.msk.f32.gmra.mxu1 %vm1151_vm1, %v1147_v61 }
 0x22f   : > { %1399 = vmatpush.msra.mxu2 %v1346_v62  ;;  %1422 = vmatpush.msra.mxu3 %v1347_v63 }
 0x230   : > { %1354 = vmatpush.msra.mxu0 %v1340_v0  ;;  %1377 = vmatpush.msra.mxu1 %v1341_v1  ;;  %v2110_v0 = vld [vmem:[%s3250_s12] ss:$0 sm:$0xff] }
 0x231   : > { %1400 = vmatpush.msra.mxu2 %v1342_v2  ;;  %1423 = vmatpush.msra.mxu3 %v1343_v3 }
 0x232   : > { %1355 = vmatpush.msra.mxu0 %v1336_v4  ;;  %1378 = vmatpush.msra.mxu1 %v1337_v5 }
 0x233   : > { %1401 = vmatpush.msra.mxu2 %v1338_v6  ;;  %1424 = vmatpush.msra.mxu3 %v1339_v7 }
 0x234   : > { %2065 = vmatmul.msk.f32.gmra.mxu2 %vm1151_vm1, %v2063_v8  ;;  %2069 = vmatmul.msk.f32.gmra.mxu3 %vm1151_vm1, %v2067_v9 }
 0x235   : > { %1356 = vmatpush.msra.mxu0 %v1332_v10  ;;  %1379 = vmatpush.msra.mxu1 %v1333_v11 }
 0x236   : > { %1402 = vmatpush.msra.mxu2 %v1334_v12  ;;  %1425 = vmatpush.msra.mxu3 %v1335_v13 }
 0x237   : > { %1357 = vmatpush.msra.mxu0 %v1328_v14  ;;  %1380 = vmatpush.msra.mxu1 %v1329_v15  ;;  %v1613_v15 = vld [vmem:[%s3242_s4 + $0x1e0] sm:$0xff] }
 0x238   : > { %1403 = vmatpush.msra.mxu2 %v1330_v16  ;;  %1426 = vmatpush.msra.mxu3 %v1331_v17  ;;  %v1609_v16 = vld [vmem:[%s3242_s4 + $0x1c0] sm:$0xff] }
 0x239   : > { %1358 = vmatpush.msra.mxu0 %v1324_v18  ;;  %1381 = vmatpush.msra.mxu1 %v1325_v19  ;;  %v1605_v17 = vld [vmem:[%s3242_s4 + $0x1a0] sm:$0xff] }
 0x23a   : > { %1404 = vmatpush.msra.mxu2 %v1326_v20  ;;  %1427 = vmatpush.msra.mxu3 %v1327_v21  ;;  %v1601_v18 = vld [vmem:[%s3242_s4 + $0x180] sm:$0xff] }
 0x23b   : > { %1359 = vmatpush.msra.mxu0 %v1320_v22  ;;  %1382 = vmatpush.msra.mxu1 %v1321_v23  ;;  %v1597_v19 = vld [vmem:[%s3242_s4 + $0x160] sm:$0xff] }
 0x23c   : > { %1405 = vmatpush.msra.mxu2 %v1322_v24  ;;  %1428 = vmatpush.msra.mxu3 %v1323_v25 }
 0x23d   : > { %1360 = vmatpush.msra.mxu0 %v1316_v26  ;;  %1383 = vmatpush.msra.mxu1 %v1317_v27  ;;  %v2070_v26 = vld [vmem:[%s3246_s8 + $0x8] sm:$0xff]  ;;  %v1444_v27 = vld [vmem:[%s3246_s8] sm:$0xff] }
 0x23e   : > { %1406 = vmatpush.msra.mxu2 %v1318_v28  ;;  %1429 = vmatpush.msra.mxu3 %v1319_v29  ;;  %v1614_v28 = vld [vmem:[%s3242_s4 + $0x1e8] sm:$0xff] }
 0x23f   : > { %1361 = vmatpush.msra.mxu0 %v1312_v30  ;;  %1384 = vmatpush.msra.mxu1 %v1313_v31  ;;  %v1610_v29 = vld [vmem:[%s3242_s4 + $0x1c8] sm:$0xff] }
 0x240   : > { %1407 = vmatpush.msra.mxu2 %v1314_v32  ;;  %1430 = vmatpush.msra.mxu3 %v1315_v33  ;;  %v1606_v30 = vld [vmem:[%s3242_s4 + $0x1a8] sm:$0xff]  ;;  %v2075_v33 = vld [vmem:[%s3246_s8 + $0x18] sm:$0xff] }
 0x241   : > { %1362 = vmatpush.msra.mxu0 %v1308_v34  ;;  %1385 = vmatpush.msra.mxu1 %v1309_v35  ;;  %v1615_v34 = vld [vmem:[%s3242_s4 + $0x1f0] sm:$0xff] }
 0x242   : > { %1408 = vmatpush.msra.mxu2 %v1310_v36  ;;  %1431 = vmatpush.msra.mxu3 %v1311_v37  ;;  %v2073_v35 = vld [vmem:[%s3246_s8 + $0x10] sm:$0xff]  ;;  %v1616_v36 = vld [vmem:[%s3242_s4 + $0x1f8] sm:$0xff] }
 0x243   : > { %1363 = vmatpush.msra.mxu0 %v1304_v38  ;;  %1386 = vmatpush.msra.mxu1 %v1305_v39  ;;  %v1611_v37 = vld [vmem:[%s3242_s4 + $0x1d0] sm:$0xff]  ;;  %v1602_v38 = vld [vmem:[%s3242_s4 + $0x188] sm:$0xff]  ;;  %v1612_v39 = vld [vmem:[%s3242_s4 + $0x1d8] sm:$0xff] }
 0x244   : > { %1409 = vmatpush.msra.mxu2 %v1306_v40  ;;  %1432 = vmatpush.msra.mxu3 %v1307_v41  ;;  %v1607_v40 = vld [vmem:[%s3242_s4 + $0x1b0] sm:$0xff]  ;;  %v1598_v41 = vld [vmem:[%s3242_s4 + $0x168] sm:$0xff] }
 0x245   : > { %1364 = vmatpush.msra.mxu0 %v1300_v42  ;;  %1387 = vmatpush.msra.mxu1 %v1301_v43  ;;  %v1608_v42 = vld [vmem:[%s3242_s4 + $0x1b8] sm:$0xff]  ;;  %v1603_v43 = vld [vmem:[%s3242_s4 + $0x190] sm:$0xff] }
 0x246   : > { %1410 = vmatpush.msra.mxu2 %v1302_v44  ;;  %1433 = vmatpush.msra.mxu3 %v1303_v45  ;;  %v1604_v44 = vld [vmem:[%s3242_s4 + $0x198] sm:$0xff]  ;;  %v1599_v45 = vld [vmem:[%s3242_s4 + $0x170] sm:$0xff] }
 0x247   : > { %1365 = vmatpush.msra.mxu0 %v1296_v46  ;;  %1388 = vmatpush.msra.mxu1 %v1297_v47  ;;  %v1600_v46 = vld [vmem:[%s3242_s4 + $0x178] sm:$0xff]  ;;  %v1595_v47 = vld [vmem:[%s3242_s4 + $0x150] sm:$0xff] }
 0x248   : > { %1411 = vmatpush.msra.mxu2 %v1298_v48  ;;  %1434 = vmatpush.msra.mxu3 %v1299_v49  ;;  %v1593_v48 = vld [vmem:[%s3242_s4 + $0x140] sm:$0xff]  ;;  %v1594_v49 = vld [vmem:[%s3242_s4 + $0x148] sm:$0xff] }
 0x249   : > { %1366 = vmatpush.msra.mxu0 %v1292_v50  ;;  %1389 = vmatpush.msra.mxu1 %v1293_v51  ;;  %v1596_v50 = vld [vmem:[%s3242_s4 + $0x158] sm:$0xff]  ;;  %v1591_v51 = vld [vmem:[%s3242_s4 + $0x130] sm:$0xff] }
 0x24a   : > { %1412 = vmatpush.msra.mxu2 %v1294_v52  ;;  %1435 = vmatpush.msra.mxu3 %v1295_v53  ;;  %v1589_v52 = vld [vmem:[%s3242_s4 + $0x120] sm:$0xff]  ;;  %v1590_v53 = vld [vmem:[%s3242_s4 + $0x128] sm:$0xff] }
 0x24b   : > { %1367 = vmatpush.msra.mxu0 %v1288_v54  ;;  %1390 = vmatpush.msra.mxu1 %v1289_v55  ;;  %v1587_v54 = vld [vmem:[%s3242_s4 + $0x110] sm:$0xff]  ;;  %v1592_v55 = vld [vmem:[%s3242_s4 + $0x138] sm:$0xff] }
 0x24c   : > { %1413 = vmatpush.msra.mxu2 %v1290_v56  ;;  %1436 = vmatpush.msra.mxu3 %v1291_v57  ;;  %v1585_v56 = vld [vmem:[%s3242_s4 + $0x100] sm:$0xff]  ;;  %v1586_v57 = vld [vmem:[%s3242_s4 + $0x108] sm:$0xff] }
 0x24d   : > { %1617 = vmatpush.msrb.mxu0 %v1613_v15  ;;  %v1563_v15 = vld [vmem:[%s3242_s4 + $0x50] sm:$0xff] }
 0x24f   : > { %1618 = vmatpush.msrb.mxu0 %v1609_v16  ;;  %v1561_v16 = vld [vmem:[%s3242_s4 + $0x40] sm:$0xff] }
 0x251   : > { %1619 = vmatpush.msrb.mxu0 %v1605_v17  ;;  %v1562_v17 = vld [vmem:[%s3242_s4 + $0x48] sm:$0xff] }
 0x253   : > { %1620 = vmatpush.msrb.mxu0 %v1601_v18  ;;  %v1564_v18 = vld [vmem:[%s3242_s4 + $0x58] sm:$0xff] }
 0x255   : > { %1621 = vmatpush.msrb.mxu0 %v1597_v19  ;;  %v1559_v19 = vld [vmem:[%s3242_s4 + $0x30] sm:$0xff] }
 0x257   : > { %1622 = vmatpush.msrb.mxu0 %v1593_v48 }
 0x259   : > { %1623 = vmatpush.msrb.mxu0 %v1589_v52  ;;  %v1815_v52 = vld [vmem:[%s3243_s5 + $0x48] sm:$0xff] }
 0x25b   : > { %1624 = vmatpush.msrb.mxu0 %v1585_v56  ;;  %v1811_v56 = vld [vmem:[%s3243_s5 + $0x28] sm:$0xff] }
 0x2a3   : > { %v1175_v58 = vpop.f32.mrf.mxu0  ;;  %v1204_v59 = vpop.f32.mrf.mxu1 }
 0x2a4   : > { %v1205_v60 = vadd.f32 %v1204_v59, %v1175_v58  ;;  %v1583_v58 = vld [vmem:[%s3242_s4 + $0xf0] sm:$0xff]  ;;  %v1588_v59 = vld [vmem:[%s3242_s4 + $0x118] sm:$0xff] }
 0x2ab   : > { %v1178_v1 = vpop.f32.mrf.mxu0  ;;  %v1207_v2 = vpop.f32.mrf.mxu1 }
 0x2ac   : > { %v1208_v5 = vadd.f32 %v1207_v2, %v1178_v1  ;;  %v1578_v1 = vld [vmem:[%s3242_s4 + $0xc8] sm:$0xff]  ;;  %v1580_v2 = vld [vmem:[%s3242_s4 + $0xd8] sm:$0xff] }
 0x2af   : > { %v1236_v61 = vpop.f32.mrf.mxu2  ;;  %v1270_v62 = vpop.f32.mrf.mxu3 }
 0x2b0   : > { %v1242_v63 = vadd.f32 %v1236_v61, %v1205_v60  ;;  %v1581_v60 = vld [vmem:[%s3242_s4 + $0xe0] sm:$0xff]  ;;  %v1582_v61 = vld [vmem:[%s3242_s4 + $0xe8] sm:$0xff] }
 0x2b1   : > { %1625 = vmatpush.msrb.mxu0 %v1581_v60  ;;  %v1807_v60 = vld [vmem:[%s3243_s5 + $0x8] sm:$0xff] }
 0x2b2   : > { %v1276_v3 = vadd.f32 %v1270_v62, %v1242_v63  ;;  %v1579_v62 = vld [vmem:[%s3242_s4 + $0xd0] sm:$0xff]  ;;  %v1584_v63 = vld [vmem:[%s3242_s4 + $0xf8] sm:$0xff] }
 0x2b4   : > { %v1282_v4 = vadd.f32 %v2110_v0, %v1276_v3  ;;  %v1575_v3 = vld [vmem:[%s3242_s4 + $0xb0] sm:$0xff] }
 0x2b6   : > { %v1284_v6 = vmul.f32 0.2, %v1282_v4 }
 0x2b7   : > { %v1239_v7 = vpop.f32.mrf.mxu2  ;;  %v1273_v8 = vpop.f32.mrf.mxu3 }
 0x2b8   : > { %v1286_v9 = vmax.f32 %v1282_v4, %v1284_v6  ;;  %v1243_v10 = vadd.f32 %v1239_v7, %v1208_v5  ;;  %v1573_v4 = vld [vmem:[%s3242_s4 + $0xa0] sm:$0xff]  ;;  %v1574_v5 = vld [vmem:[%s3242_s4 + $0xa8] sm:$0xff]  ;;  %v1576_v6 = vld [vmem:[%s3242_s4 + $0xb8] sm:$0xff] }
 0x2b9   : > { %v1571_v7 = vld [vmem:[%s3242_s4 + $0x90] sm:$0xff] }
 0x2ba   : > { %v1277_v11 = vadd.f32 %v1273_v8, %v1243_v10  ;;  %1368 = vmatmul.f32.vlgmr.msra.gmra.mxu0 %v1286_v9  ;;  %1391 = vmatmul.f32.vlgmr.msra.gmra.mxu1 %v1286_v9  ;;  %v1569_v8 = vld [vmem:[%s3242_s4 + $0x80] sm:$0xff]  ;;  %v1572_v10 = vld [vmem:[%s3242_s4 + $0x98] sm:$0xff] }
 0x2bb   : > { %1414 = vmatmul.f32.vlgmr.msra.gmra.mxu2 %v1286_v9  ;;  %1437 = vmatmul.f32.vlgmr.msra.gmra.mxu3 %v1286_v9  ;;  %v1570_v9 = vld [vmem:[%s3242_s4 + $0x88] sm:$0xff] }
 0x2bc   : > { %v1283_v12 = vadd.f32 %v2110_v0, %v1277_v11  ;;  %v1577_v0 = vld [vmem:[%s3242_s4 + $0xc0] sm:$0xff]  ;;  %v1567_v11 = vld [vmem:[%s3242_s4 + $0x70] sm:$0xff] }
 0x2bd   : > { %1626 = vmatpush.msrb.mxu0 %v1577_v0 }
 0x2be   : > { %v1285_v13 = vmul.f32 0.2, %v1283_v12 }
 0x2bf   : > { %1627 = vmatpush.msrb.mxu0 %v1573_v4  ;;  %v2112_v4 = vld [vmem:[%s3252_s14] ss:$0 sm:$0xff] }
 0x2c0   : > { %v1287_v14 = vmax.f32 %v1283_v12, %v1285_v13  ;;  %v1565_v12 = vld [vmem:[%s3242_s4 + $0x60] sm:$0xff]  ;;  %v1566_v13 = vld [vmem:[%s3242_s4 + $0x68] sm:$0xff] }
 0x2c1   : > { %1628 = vmatpush.msrb.mxu0 %v1569_v8 }
 0x2c2   : > { %1371 = vmatmul.f32.gmra.mxu0 %v1287_v14  ;;  %1394 = vmatmul.f32.gmra.mxu1 %v1287_v14 }
 0x2c3   : > { %1417 = vmatmul.f32.gmra.mxu2 %v1287_v14  ;;  %1440 = vmatmul.f32.gmra.mxu3 %v1287_v14  ;;  %v1568_v14 = vld [vmem:[%s3242_s4 + $0x78] sm:$0xff] }
 0x2c4   : > { %1629 = vmatpush.msrb.mxu0 %v1565_v12 }
 0x2c6   : > { %1630 = vmatpush.msrb.mxu0 %v1561_v16  ;;  %v2092_v16 = vld [vmem:[%s3248_s10 + $0x6] sm:$0x3] }
 0x337   : > { %v1369_v20 = vpop.f32.mrf.mxu0  ;;  %v1392_v21 = vpop.f32.mrf.mxu1 }
 0x33e   : > { %v1415_v22 = vpop.f32.mrf.mxu2  ;;  %v1438_v23 = vpop.f32.mrf.mxu3 }
 0x33f   : > { %v1372_v24 = vpop.f32.mrf.mxu0  ;;  %v1395_v25 = vpop.f32.mrf.mxu1 }
 0x340   : > { %1465 = vmatpush.msrb.mxu2 %v1395_v25  ;;  %1488 = vmatpush.msrb.mxu1 %v1372_v24  ;;  %v1553_v24 = vld [vmem:[%s3242_s4] sm:$0xff]  ;;  %v1554_v25 = vld [vmem:[%s3242_s4 + $0x8] sm:$0xff] }
 0x342   : > { %1466 = vmatpush.msrb.mxu2 %v1392_v21  ;;  %1489 = vmatpush.msrb.mxu1 %v1369_v20  ;;  %v1557_v20 = vld [vmem:[%s3242_s4 + $0x20] sm:$0xff]  ;;  %v1558_v21 = vld [vmem:[%s3242_s4 + $0x28] sm:$0xff] }
 0x343   : > { %2071 = vmatmul.msk.f32.vlgmr.msrb.gmra.mxu2 %vm1447_vm2, %v2070_v26  ;;  %2072 = vmatmul.msk.f32.vlgmr.msrb.gmra.mxu1 %vm1447_vm2, %v1444_v27  ;;  %v1556_v26 = vld [vmem:[%s3242_s4 + $0x18] sm:$0xff] }
 0x344   : > { %1637 = vmatpush.msra.mxu1 %v1614_v28  ;;  %1631 = vmatpush.msrb.mxu0 %v1557_v20 }
 0x346   : > { %v1418_v31 = vpop.f32.mrf.mxu2  ;;  %v1441_v32 = vpop.f32.mrf.mxu3  ;;  %1638 = vmatpush.msra.mxu1 %v1610_v29  ;;  %1632 = vmatpush.msrb.mxu0 %v1553_v24 }
 0x347   : > { %1513 = vmatpush.msra.mxu2 %v1418_v31  ;;  %1539 = vmatpush.msrb.mxu3 %v1441_v32 }
 0x348   : > { %1639 = vmatpush.msra.mxu1 %v1606_v30 }
 0x349   : > { %1514 = vmatpush.msra.mxu2 %v1415_v22  ;;  %1540 = vmatpush.msrb.mxu3 %v1438_v23  ;;  %v1555_v22 = vld [vmem:[%s3242_s4 + $0x10] sm:$0xff]  ;;  %v1560_v23 = vld [vmem:[%s3242_s4 + $0x38] sm:$0xff] }
 0x34a   : > { %2076 = vmatmul.msk.f32.vlgmr.msrb.gmra.mxu3 %vm1447_vm2, %v2075_v33  ;;  %1640 = vmatpush.msra.mxu1 %v1602_v38  ;;  %v2111_v33 = vld [vmem:[%s3251_s13] ss:$0 sm:$0xff] }
 0x34b   : > { %1657 = vmatpush.msrb.mxu2 %v1615_v34  ;;  %1677 = vmatpush.msra.mxu3 %v1616_v36  ;;  %v1697_v38 = vld [vmem:[%s3247_s9] sm:$0xf] }
 0x34c   : > { %2074 = vmatmul.msk.f32.vlgmr.msra.gmra.mxu2 %vm1447_vm2, %v2073_v35  ;;  %1641 = vmatpush.msra.mxu1 %v1598_v41 }
 0x34d   : > { %1658 = vmatpush.msrb.mxu2 %v1611_v37  ;;  %1678 = vmatpush.msra.mxu3 %v1612_v39 }
 0x34e   : > { %1642 = vmatpush.msra.mxu1 %v1594_v49  ;;  %v1818_v49 = vld [vmem:[%s3243_s5 + $0x60] sm:$0xff] }
 0x34f   : > { %1659 = vmatpush.msrb.mxu2 %v1607_v40  ;;  %1679 = vmatpush.msra.mxu3 %v1608_v42  ;;  %v2077_v40 = vld [vmem:[%s3247_s9 + $0x4] sm:$0xf]  ;;  %v1821_v42 = vld [vmem:[%s3243_s5 + $0x78] sm:$0xff] }
 0x350   : > { %1643 = vmatpush.msra.mxu1 %v1590_v53  ;;  %v1814_v53 = vld [vmem:[%s3243_s5 + $0x40] sm:$0xff] }
 0x351   : > { %1660 = vmatpush.msrb.mxu2 %v1603_v43  ;;  %1680 = vmatpush.msra.mxu3 %v1604_v44  ;;  %v1820_v43 = vld [vmem:[%s3243_s5 + $0x70] sm:$0xff]  ;;  %v2080_v44 = vld [vmem:[%s3247_s9 + $0x8] sm:$0xf] }
 0x352   : > { %1644 = vmatpush.msra.mxu1 %v1586_v57  ;;  %v1810_v57 = vld [vmem:[%s3243_s5 + $0x20] sm:$0xff] }
 0x353   : > { %1661 = vmatpush.msrb.mxu2 %v1599_v45  ;;  %1681 = vmatpush.msra.mxu3 %v1600_v46  ;;  %v2082_v46 = vld [vmem:[%s3247_s9 + $0xc] sm:$0xf] }
 0x354   : > { %1645 = vmatpush.msra.mxu1 %v1582_v61  ;;  %v1806_v61 = vld [vmem:[%s3243_s5] sm:$0xff] }
 0x355   : > { %1662 = vmatpush.msrb.mxu2 %v1595_v47  ;;  %1682 = vmatpush.msra.mxu3 %v1596_v50  ;;  %v1819_v47 = vld [vmem:[%s3243_s5 + $0x68] sm:$0xff]  ;;  %v1817_v50 = vld [vmem:[%s3243_s5 + $0x58] sm:$0xff] }
 0x356   : > { %1646 = vmatpush.msra.mxu1 %v1578_v1 }
 0x357   : > { %1663 = vmatpush.msrb.mxu2 %v1591_v51  ;;  %1683 = vmatpush.msra.mxu3 %v1592_v55  ;;  %v1816_v51 = vld [vmem:[%s3243_s5 + $0x50] sm:$0xff] }
 0x358   : > { %1647 = vmatpush.msra.mxu1 %v1574_v5  ;;  %v1812_v55 = vld [vmem:[%s3243_s5 + $0x30] sm:$0xff] }
 0x359   : > { %1664 = vmatpush.msrb.mxu2 %v1587_v54  ;;  %1684 = vmatpush.msra.mxu3 %v1588_v59  ;;  %v1813_v54 = vld [vmem:[%s3243_s5 + $0x38] sm:$0xff]  ;;  %v1808_v59 = vld [vmem:[%s3243_s5 + $0x10] sm:$0xff] }
 0x35a   : > { %1648 = vmatpush.msra.mxu1 %v1570_v9 }
 0x35b   : > { %1665 = vmatpush.msrb.mxu2 %v1583_v58  ;;  %1685 = vmatpush.msra.mxu3 %v1584_v63  ;;  %v1809_v58 = vld [vmem:[%s3243_s5 + $0x18] sm:$0xff] }
 0x35c   : > { %1649 = vmatpush.msra.mxu1 %v1566_v13  ;;  %v2084_v13 = vld [vmem:[%s3248_s10 + $0x2] sm:$0x3] }
 0x35d   : > { %1666 = vmatpush.msrb.mxu2 %v1579_v62  ;;  %1686 = vmatpush.msra.mxu3 %v1580_v2 }
 0x35e   : > { %1650 = vmatpush.msra.mxu1 %v1562_v17 }
 0x35f   : > { %1667 = vmatpush.msrb.mxu2 %v1575_v3  ;;  %1687 = vmatpush.msra.mxu3 %v1576_v6 }
 0x360   : > { %1651 = vmatpush.msra.mxu1 %v1558_v21 }
 0x361   : > { %1668 = vmatpush.msrb.mxu2 %v1571_v7  ;;  %1688 = vmatpush.msra.mxu3 %v1572_v10  ;;  %v1842_v10 = vld [vmem:[%s3248_s10] sm:$0x3] }
 0x362   : > { %1652 = vmatpush.msra.mxu1 %v1554_v25 }
 0x363   : > { %1669 = vmatpush.msrb.mxu2 %v1567_v11  ;;  %1689 = vmatpush.msra.mxu3 %v1568_v14  ;;  %v2089_v14 = vld [vmem:[%s3248_s10 + $0x4] sm:$0x3] }
 0x365   : > { %1670 = vmatpush.msrb.mxu2 %v1563_v15  ;;  %1690 = vmatpush.msra.mxu3 %v1564_v18 }
 0x367   : > { %1671 = vmatpush.msrb.mxu2 %v1559_v19  ;;  %1691 = vmatpush.msra.mxu3 %v1560_v23  ;;  %v2113_v23 = vld [vmem:[#allocation2] ss:$0 sm:$0xff] }
 0x369   : > { %1672 = vmatpush.msrb.mxu2 %v1555_v22  ;;  %1692 = vmatpush.msra.mxu3 %v1556_v26 }
 0x3c0   : > { %v1491_v28 = vpop.f32.mrf.mxu1 }
 0x3c6   : > { %v1468_v27 = vpop.f32.mrf.mxu2 }
 0x3c7   : > { %v1492_v29 = vadd.f32 %v1491_v28, %v1468_v27 }
 0x3cd   : > { %v1542_v31 = vpop.f32.mrf.mxu3 }
 0x3cf   : > { %v1516_v30 = vpop.f32.mrf.mxu2 }
 0x3d0   : > { %v1519_v32 = vadd.f32 %v1516_v30, %v1492_v29 }
 0x3d2   : > { %v1545_v34 = vadd.f32 %v1542_v31, %v1519_v32 }
 0x3d4   : > { %v1550_v35 = vadd.f32 %v2111_v33, %v1545_v34 }
 0x3d6   : > { %v1551_v36 = vmul.f32 0.2, %v1550_v35 }
 0x3d8   : > { %v1552_v37 = vmax.f32 %v1550_v35, %v1551_v36 }
 0x3da   : > { %1673 = vmatmul.f32.vlgmr.msrb.gmra.mxu2 %v1552_v37  ;;  %1633 = vmatmul.f32.vlgmr.msrb.gmra.mxu0 %v1552_v37 }
 0x3db   : > { %1653 = vmatmul.f32.vlgmr.msra.gmra.mxu1 %v1552_v37  ;;  %1693 = vmatmul.f32.vlgmr.msra.gmra.mxu3 %v1552_v37 }
 0x457   : > { %v1634_v39 = vpop.f32.mrf.mxu0 }
 0x458   : > { %v1654_v41 = vpop.f32.mrf.mxu1  ;;  %1742 = vmatpush.msrb.mxu1 %v1634_v39 }
 0x459   : > { %1719 = vmatpush.msra.mxu0 %v1654_v41  ;;  %2079 = vmatmul.msk.f32.vlgmr.msrb.gmra.mxu1 %vm1700_vm3, %v1697_v38 }
 0x45a   : > { %2078 = vmatmul.msk.f32.vlgmr.msra.gmra.mxu0 %vm1700_vm3, %v2077_v40 }
 0x45b   : > { %1822 = vmatpush.msrb.mxu0 %v1821_v42 }
 0x45d   : > { %v1674_v45 = vpop.f32.mrf.mxu2  ;;  %1823 = vmatpush.msrb.mxu0 %v1820_v43 }
 0x45e   : > { %1767 = vmatpush.msra.mxu2 %v1674_v45  ;;  %v1694_v48 = vpop.f32.mrf.mxu3 }
 0x45f   : > { %2081 = vmatmul.msk.f32.vlgmr.msra.gmra.mxu2 %vm1700_vm3, %v2080_v44  ;;  %1793 = vmatpush.msrb.mxu3 %v1694_v48 }
 0x460   : > { %2083 = vmatmul.msk.f32.vlgmr.msrb.gmra.mxu3 %vm1700_vm3, %v2082_v46  ;;  %1824 = vmatpush.msrb.mxu0 %v1819_v47 }
 0x462   : > { %1825 = vmatpush.msrb.mxu0 %v1818_v49 }
 0x464   : > { %1826 = vmatpush.msrb.mxu0 %v1817_v50 }
 0x466   : > { %1827 = vmatpush.msrb.mxu0 %v1816_v51 }
 0x468   : > { %1828 = vmatpush.msrb.mxu0 %v1815_v52 }
 0x46a   : > { %1829 = vmatpush.msrb.mxu0 %v1814_v53 }
 0x46c   : > { %1830 = vmatpush.msrb.mxu0 %v1813_v54 }
 0x46e   : > { %1831 = vmatpush.msrb.mxu0 %v1812_v55 }
 0x470   : > { %1832 = vmatpush.msrb.mxu0 %v1811_v56 }
 0x472   : > { %1833 = vmatpush.msrb.mxu0 %v1810_v57 }
 0x474   : > { %1834 = vmatpush.msrb.mxu0 %v1809_v58 }
 0x476   : > { %1835 = vmatpush.msrb.mxu0 %v1808_v59 }
 0x478   : > { %1836 = vmatpush.msrb.mxu0 %v1807_v60 }
 0x47a   : > { %1837 = vmatpush.msrb.mxu0 %v1806_v61 }
 0x4d6   : > { %v1744_v63 = vpop.f32.mrf.mxu1 }
 0x4d7   : > { %v1721_v62 = vpop.f32.mrf.mxu0 }
 0x4d8   : > { %v1745_v0 = vadd.f32 %v1744_v63, %v1721_v62 }
 0x4e2   : > { %v1769_v1 = vpop.f32.mrf.mxu2 }
 0x4e3   : > { %v1772_v2 = vadd.f32 %v1769_v1, %v1745_v0  ;;  %v1795_v3 = vpop.f32.mrf.mxu3 }
 0x4e5   : > { %v1798_v5 = vadd.f32 %v1795_v3, %v1772_v2 }
 0x4e7   : > { %v1803_v6 = vadd.f32 %v2112_v4, %v1798_v5 }
 0x4e9   : > { %v1804_v7 = vmul.f32 0.2, %v1803_v6 }
 0x4eb   : > { %v1805_v8 = vmax.f32 %v1803_v6, %v1804_v7 }
 0x4ed   : > { %1838 = vmatmul.f32.vlgmr.msrb.gmra.mxu0 %v1805_v8 }
 0x56a   : > { %v1839_v9 = vpop.f32.mrf.mxu0 }
 0x56b   : > { %1846 = vrot.lane.b32.xlu0 %v1839_v9, %s2122_s21  ;;  %1932 = vrot.lane.b32.xlu1 %v1839_v9, %s2123_s17  ;;  %s521_s21 = scalar_lea.vmem %s3254_s16, %s2027_s28 }
 0x56c   : > { %2087 = vmatpush.msk.msrb.mxu2 %vm1852_vm4, %v1839_v9 }
 0x56d   : > { %2088 = vmatmul.msk.f32.vlgmr.msrb.gmra.mxu2 %vm1848_vm5, %v1842_v10 }
 0x573   : > { %1902 = vrot.lane.b32.xlu0 %v1839_v9, %s2124_s18 }
 0x5dd   : > { %v1847_v11 = vpop.permute.xlu0 %1846  ;;  %v1933_v12 = vpop.permute.xlu1 %1932 }
 0x5de   : > { %2085 = vmatpush.msk.msra.mxu1 %vm1852_vm4, %v1847_v11 }
 0x5df   : > { %2086 = vmatmul.msk.f32.vlgmr.msra.gmra.mxu1 %vm1848_vm5, %v2084_v13 }
 0x5e0   : > { %2093 = vmatpush.msk.msrb.mxu1 %vm1852_vm4, %v1933_v12 }
 0x5e5   : > { %v1903_v15 = vpop.permute.xlu0 %1902 }
 0x5e6   : > { %2090 = vmatpush.msk.msra.mxu3 %vm1852_vm4, %v1903_v15 }
 0x5e7   : > { %2091 = vmatmul.msk.f32.vlgmr.msra.gmra.mxu3 %vm1848_vm5, %v2089_v14  ;;  %2094 = vmatmul.msk.f32.vlgmr.msrb.gmra.mxu1 %vm1848_vm5, %v2092_v16 }
 0x5f0   : > { %v1897_v18 = vpop.f32.mrf.mxu2 }
 0x65c   : > { %v1872_v17 = vpop.f32.mrf.mxu1 }
 0x65d   : > { %v1898_v19 = vadd.f32 %v1897_v18, %v1872_v17 }
 0x664   : > { %v1956_v21 = vpop.f32.mrf.mxu1 }
 0x66a   : > { %v1926_v20 = vpop.f32.mrf.mxu3 }
 0x66b   : > { %v1929_v22 = vadd.f32 %v1926_v20, %v1898_v19 }
 0x66d   : > { %v1959_v24 = vadd.f32 %v1956_v21, %v1929_v22 }
 0x66f   : > { %v1964_v25 = vadd.f32 %v2113_v23, %v1959_v24 }
 0x671   : > { %1966 = vst.msk [vmem:[%s521_s21] sm:$0x3] %vm1965_vm6, %v1964_v25 }
 0x672 PF: > { %s28_s23 = sadd.s32 1, %s2120_s23  }
 0x673   : > { %p25_p4 = scmp.ge.s32.totalorder %s28_s23, 4  }
 0x675   :  { %27 = sbr.rel (!%p25_p4) target bundleno = 3 (0x3), region = 129 }

</bundles_post_ra>
